<compile_context>
chip_gen: v7x
topology: tpu7x:2x2x1
jax: 0.10.0
libtpu: 0.0.40
codegen_flags: <defaults>
</compile_context>

<pallas_src>
import functools

import jax
import jax.numpy as jnp
from jax.experimental import pallas as pl
from jax.experimental.pallas import tpu as pltpu

_LANE = 128  # hidden feature dims padded to a multiple of the lane width


def _round_up(n, m):
    return ((n + m - 1) // m) * m


def _pad_to(a, shape):
    pads = [(0, t - s) for s, t in zip(a.shape, shape)]
    if any(p for _, p in pads):
        return jnp.pad(a, pads)
    return a


def _mlp_kernel(x_ref, w1_ref, b1_ref, w2_ref, b2_ref, w3_ref, b3_ref, o_ref):
    # x tile may arrive f32 or bf16; cast to the weight dtype (bf16) for the MXU.
    x = x_ref[...].astype(w1_ref.dtype)
    h1 = jnp.dot(x, w1_ref[...], preferred_element_type=jnp.float32) + b1_ref[...]
    h1 = jnp.maximum(h1, 0.0).astype(w2_ref.dtype)
    h2 = jnp.dot(h1, w2_ref[...], preferred_element_type=jnp.float32) + b2_ref[...]
    h2 = jnp.maximum(h2, 0.0).astype(w3_ref.dtype)
    out = jnp.dot(h2, w3_ref[...], preferred_element_type=jnp.float32) + b3_ref[...]
    o_ref[...] = out.astype(o_ref.dtype)


def _resident_spec(shape):
    """Grid-invariant operand: constant index_map, single-buffered (saves VMEM)."""
    return pl.BlockSpec(shape, lambda i: (0,) * len(shape),
                        pipeline_mode=pl.Buffered(1))


def _tpu_generation():
    """(tensorcores_per_chip, vmem_budget_cap_bytes); safe single-core fallback."""
    kind = ""
    try:
        kind = jax.devices()[0].device_kind.lower()
    except Exception:
        pass
    is_v7 = "v7" in kind
    num_cores = 2 if is_v7 else 1            # v5e / v6e are single-TC chips
    vmem_cap = (40 << 20) if is_v7 else (96 << 20)
    return num_cores, vmem_cap


def prepare_mlp_params(w1, b1, w2, b2, w3, b3, *, weight_dtype=jnp.bfloat16):
    """One-time parameter prep (at load time, NOT per forward call).

    PyTorch layout w_i: [out, in], b_i: [out].  Weights are transposed to [in, out],
    hidden feature dims zero-padded to multiples of 128 lanes, cast to bf16.  The
    input and output dims stay UNPADDED so the activation stream and the result
    writeback carry no padding bytes.  Biases stay f32 [1, dim] (epilogue is f32).
    """
    in_dim = w1.shape[1]
    h1, h2, out_dim = w1.shape[0], w2.shape[0], w3.shape[0]
    h1_p, h2_p = _round_up(h1, _LANE), _round_up(h2, _LANE)

    def prep_w(w, rows, cols):
        return _pad_to(jnp.asarray(w, jnp.float32).T.astype(weight_dtype), (rows, cols))

    def prep_b(b, cols):
        return _pad_to(jnp.asarray(b, jnp.float32).reshape(1, -1), (1, cols))

    return (prep_w(w1, in_dim, h1_p), prep_b(b1, h1_p),
            prep_w(w2, h1_p, h2_p), prep_b(b2, h2_p),
            prep_w(w3, h2_p, out_dim), prep_b(b3, out_dim))


@functools.partial(jax.jit, static_argnames=("out_dtype", "batch_tile_cap"))
def simple_mlp_forward(x, params, *, out_dtype=jnp.float32, batch_tile_cap=None):
    """Fused MLP forward.  x: [B, input_size] (f32 or bf16); params from prepare_mlp_params."""
    w1t, b1r, w2t, b2r, w3t, b3r = params
    B, in_dim = x.shape
    h1_p, h2_p, out_dim = w1t.shape[1], w2t.shape[1], w3t.shape[1]

    num_cores, vmem_cap = _tpu_generation()
    x_itemsize = jnp.dtype(x.dtype).itemsize
    out_itemsize = jnp.dtype(out_dtype).itemsize

    # Resident (grid-invariant) footprint: bf16 weights + f32 biases, single-buffered.
    weight_bytes = 2 * (in_dim * h1_p + h1_p * h2_p + h2_p * out_dim)
    bias_bytes = 4 * (h1_p + h2_p + out_dim)

    # Per-batch-row footprint: double-buffered x/out tiles + f32(+bf16) intermediates.
    per_row = (2 * in_dim * x_itemsize + 2 * out_dim * out_itemsize
               + 6 * (h1_p + h2_p) + 4 * out_dim)
    row_budget = max(vmem_cap // 2 - (weight_bytes + bias_bytes), 1 << 20)
    bt_cap = max(256, (row_budget // per_row) // 8 * 8)
    if batch_tile_cap is not None:
        bt_cap = min(bt_cap, max(8, int(batch_tile_cap)))

    # One grid step per TensorCore (v5e/v6e: 1, v7x: 2 balanced); more only if the
    # VMEM row budget forces it.  grid=1 keeps bt == B (full-array dim, no sublane
    # divisibility needed); grid>1 uses a multiple-of-8 tile and relies on masked
    # out-of-bounds stores for a partial last block.
    steps = max(num_cores, pl.cdiv(B, bt_cap))
    if steps == 1:
        bt = B
    else:
        bt = _round_up(pl.cdiv(B, steps), 8)
    grid = (pl.cdiv(B, bt),)

    vmem_need = (weight_bytes + bias_bytes
                 + 2 * bt * in_dim * x_itemsize
                 + 2 * bt * out_dim * out_itemsize
                 + bt * (6 * (h1_p + h2_p) + 4 * out_dim))
    vmem_limit = int(min(vmem_cap, max(16 << 20, 2 * vmem_need)))

    # TODO(synk): if hidden sizes grow beyond the resident-weight VMEM budget
    # (especially v7x's 64 MiB), add a grid axis over output features that streams
    # weight column-tiles (256-wide on v6e/v7x) with an f32 accumulator instead of
    # keeping all weights resident.
    return pl.pallas_call(
        _mlp_kernel,
        out_shape=jax.ShapeDtypeStruct((B, out_dim), out_dtype),
        grid_spec=pltpu.PrefetchScalarGridSpec(
            num_scalar_prefetch=0,
            grid=grid,
            in_specs=[
                pl.BlockSpec((bt, in_dim), lambda i: (i, 0)),  # streamed activations
                _resident_spec((in_dim, h1_p)),
                _resident_spec((1, h1_p)),
                _resident_spec((h1_p, h2_p)),
                _resident_spec((1, h2_p)),
                _resident_spec((h2_p, out_dim)),
                _resident_spec((1, out_dim)),
            ],
            out_specs=pl.BlockSpec((bt, out_dim), lambda i: (i, 0)),
        ),
        compiler_params=pltpu.CompilerParams(
            dimension_semantics=("parallel",),
            vmem_limit_bytes=vmem_limit,
        ),
    )(x, w1t, b1r, w2t, b2r, w3t, b3r)


def init_linear_params(key, in_features, out_features):
    """Deterministic init matching nn.Linear's uniform(-1/sqrt(in), 1/sqrt(in))."""
    kw, kb = jax.random.split(key)
    bound = 1.0 / jnp.sqrt(jnp.float32(in_features))
    w = jax.random.uniform(kw, (out_features, in_features), jnp.float32, -bound, bound)
    b = jax.random.uniform(kb, (out_features,), jnp.float32, -bound, bound)
    return w, b


if __name__ == "__main__":
    batch = 512
    input_size, hidden1_size, hidden2_size, output_size = 32, 64, 32, 16

    root = jax.random.PRNGKey(0)
    kx, k1, k2, k3 = jax.random.split(root, 4)

    x = jax.random.normal(kx, (batch, input_size), jnp.float32)
    w1, b1 = init_linear_params(k1, input_size, hidden1_size)
    w2, b2 = init_linear_params(k2, hidden1_size, hidden2_size)
    w3, b3 = init_linear_params(k3, hidden2_size, output_size)

    params = prepare_mlp_params(w1, b1, w2, b2, w3, b3)  # once, outside the hot path

    out = jax.block_until_ready(simple_mlp_forward(x, params))
    assert out.shape == (batch, output_size) and out.dtype == jnp.float32

    # Reference 1: bf16-faithful forward (same rounding points as the kernel) -> tight.
    bf = jnp.bfloat16
    r = jnp.dot(x.astype(bf), w1.T.astype(bf), preferred_element_type=jnp.float32) + b1
    r = jnp.maximum(r, 0.0).astype(bf)
    r = jnp.dot(r, w2.T.astype(bf), preferred_element_type=jnp.float32) + b2
    r = jnp.maximum(r, 0.0).astype(bf)
    ref_bf16 = jnp.dot(r, w3.T.astype(bf), preferred_element_type=jnp.float32) + b3
    assert jnp.allclose(out, ref_bf16, atol=1e-3, rtol=1e-3), "mismatch vs bf16 reference"

    # Reference 2: pure f32 forward -> loose tolerance (bf16 weights/activations).
    ref = jnp.maximum(x @ w1.T + b1, 0.0)
    ref = jnp.maximum(ref @ w2.T + b2, 0.0)
    ref = ref @ w3.T + b3
    assert jnp.allclose(out, ref, atol=5e-2, rtol=5e-2), "mismatch vs f32 reference"

    # Multi-step batch grid (what v7x or a VMEM-capped tile would use) must match.
    out_tiled = jax.block_until_ready(simple_mlp_forward(x, params, batch_tile_cap=128))
    assert jnp.allclose(out_tiled, ref_bf16, atol=1e-3, rtol=1e-3), "mismatch (tiled grid)"

    # Optional bf16 writeback (halves output HBM bytes) stays within bf16 rounding.
    out_bf16 = jax.block_until_ready(simple_mlp_forward(x, params, out_dtype=jnp.bfloat16))
    assert out_bf16.dtype == jnp.bfloat16
    assert jnp.allclose(out_bf16.astype(jnp.float32), ref_bf16, atol=3e-2, rtol=3e-2)

    print("KERNEL_OK")
</pallas_src>

<mosaic_0001>
module attributes {stable_mosaic.version = 11 : i64} {
  func.func @_mlp_kernel(%arg0: i32, %arg1: memref<512x32xf32, #tpu.memory_space<vmem>>, %arg2: memref<32x128xbf16, #tpu.memory_space<vmem>>, %arg3: memref<1x128xf32, #tpu.memory_space<vmem>>, %arg4: memref<128x128xbf16, #tpu.memory_space<vmem>>, %arg5: memref<1x128xf32, #tpu.memory_space<vmem>>, %arg6: memref<128x16xbf16, #tpu.memory_space<vmem>>, %arg7: memref<1x16xf32, #tpu.memory_space<vmem>>, %arg8: memref<512x16xf32, #tpu.memory_space<vmem>>) attributes {dimension_semantics = [#tpu.dimension_semantics<parallel>], iteration_bounds = array<i64: 1>, scalar_prefetch = 0 : i64, scratch_operands = 0 : i64, tpu.core_type = #tpu.core_type<tc>, window_params = [{transform_indices = @transform_0, window_bounds = array<i64: 512, 32>}, {pipeline_mode = #tpu.pipeline_mode<synchronous>, transform_indices = @transform_1, window_bounds = array<i64: 32, 128>}, {pipeline_mode = #tpu.pipeline_mode<synchronous>, transform_indices = @transform_2, window_bounds = array<i64: 1, 128>}, {pipeline_mode = #tpu.pipeline_mode<synchronous>, transform_indices = @transform_3, window_bounds = array<i64: 128, 128>}, {pipeline_mode = #tpu.pipeline_mode<synchronous>, transform_indices = @transform_4, window_bounds = array<i64: 1, 128>}, {pipeline_mode = #tpu.pipeline_mode<synchronous>, transform_indices = @transform_5, window_bounds = array<i64: 128, 16>}, {pipeline_mode = #tpu.pipeline_mode<synchronous>, transform_indices = @transform_6, window_bounds = array<i64: 1, 16>}, {transform_indices = @transform_7, window_bounds = array<i64: 512, 16>}]} {
    %c0 = arith.constant 0 : index
    %c0_0 = arith.constant 0 : index
    %0 = vector.load %arg1[%c0, %c0_0] : memref<512x32xf32, #tpu.memory_space<vmem>>, vector<512x32xf32>
    %1 = arith.truncf %0 : vector<512x32xf32> to vector<512x32xbf16>
    %c0_1 = arith.constant 0 : index
    %c0_2 = arith.constant 0 : index
    %2 = vector.load %arg2[%c0_1, %c0_2] : memref<32x128xbf16, #tpu.memory_space<vmem>>, vector<32x128xbf16>
    %cst = arith.constant dense<0.000000e+00> : vector<512x128xf32>
    %3 = tpu.matmul %1, %2, %cst {dimension_numbers = #tpu.dot_dimension_numbers<[1], [0], [0], [1], [0, 0, 1, 1], [], []>} : vector<512x32xbf16>, vector<32x128xbf16>, vector<512x128xf32> -> vector<512x128xf32>
    %c0_3 = arith.constant 0 : index
    %c0_4 = arith.constant 0 : index
    %4 = vector.load %arg3[%c0_3, %c0_4] : memref<1x128xf32, #tpu.memory_space<vmem>>, vector<1x128xf32>
    %5 = vector.broadcast %4 : vector<1x128xf32> to vector<512x128xf32>
    %6 = arith.addf %3, %5 : vector<512x128xf32>
    %cst_5 = arith.constant 0.000000e+00 : f32
    %7 = vector.broadcast %cst_5 : f32 to vector<512x128xf32>
    %8 = arith.maximumf %6, %7 : vector<512x128xf32>
    %9 = arith.truncf %8 : vector<512x128xf32> to vector<512x128xbf16>
    %c0_6 = arith.constant 0 : index
    %c0_7 = arith.constant 0 : index
    %10 = vector.load %arg4[%c0_6, %c0_7] : memref<128x128xbf16, #tpu.memory_space<vmem>>, vector<128x128xbf16>
    %cst_8 = arith.constant dense<0.000000e+00> : vector<512x128xf32>
    %11 = tpu.matmul %9, %10, %cst_8 {dimension_numbers = #tpu.dot_dimension_numbers<[1], [0], [0], [1], [0, 0, 1, 1], [], []>} : vector<512x128xbf16>, vector<128x128xbf16>, vector<512x128xf32> -> vector<512x128xf32>
    %c0_9 = arith.constant 0 : index
    %c0_10 = arith.constant 0 : index
    %12 = vector.load %arg5[%c0_9, %c0_10] : memref<1x128xf32, #tpu.memory_space<vmem>>, vector<1x128xf32>
    %13 = vector.broadcast %12 : vector<1x128xf32> to vector<512x128xf32>
    %14 = arith.addf %11, %13 : vector<512x128xf32>
    %cst_11 = arith.constant 0.000000e+00 : f32
    %15 = vector.broadcast %cst_11 : f32 to vector<512x128xf32>
    %16 = arith.maximumf %14, %15 : vector<512x128xf32>
    %17 = arith.truncf %16 : vector<512x128xf32> to vector<512x128xbf16>
    %c0_12 = arith.constant 0 : index
    %c0_13 = arith.constant 0 : index
    %18 = vector.load %arg6[%c0_12, %c0_13] : memref<128x16xbf16, #tpu.memory_space<vmem>>, vector<128x16xbf16>
    %cst_14 = arith.constant dense<0.000000e+00> : vector<512x16xf32>
    %19 = tpu.matmul %17, %18, %cst_14 {dimension_numbers = #tpu.dot_dimension_numbers<[1], [0], [0], [1], [0, 0, 1, 1], [], []>} : vector<512x128xbf16>, vector<128x16xbf16>, vector<512x16xf32> -> vector<512x16xf32>
    %c0_15 = arith.constant 0 : index
    %c0_16 = arith.constant 0 : index
    %20 = vector.load %arg7[%c0_15, %c0_16] : memref<1x16xf32, #tpu.memory_space<vmem>>, vector<1x16xf32>
    %21 = vector.broadcast %20 : vector<1x16xf32> to vector<512x16xf32>
    %22 = arith.addf %19, %21 : vector<512x16xf32>
    %c0_17 = arith.constant 0 : index
    %c0_18 = arith.constant 0 : index
    %23 = vector.load %arg8[%c0_17, %c0_18] : memref<512x16xf32, #tpu.memory_space<vmem>>, vector<512x16xf32>
    tpu.vector_store %arg8[%c0_17, %c0_18], %22 {strides = array<i32>} : memref<512x16xf32, #tpu.memory_space<vmem>>, vector<512x16xf32>,
    return
  }
  func.func @transform_0(%arg0: i32) -> (i32, i32) {
    %c0_i32 = arith.constant 0 : i32
    %c0_i32_0 = arith.constant 0 : i32
    return %arg0, %c0_i32 : i32, i32
  }
  func.func @transform_1(%arg0: i32) -> (i32, i32) {
    %c0_i32 = arith.constant 0 : i32
    %c0_i32_0 = arith.constant 0 : i32
    %c0_i32_1 = arith.constant 0 : i32
    return %c0_i32, %c0_i32_0 : i32, i32
  }
  func.func @transform_2(%arg0: i32) -> (i32, i32) {
    %c0_i32 = arith.constant 0 : i32
    %c0_i32_0 = arith.constant 0 : i32
    %c0_i32_1 = arith.constant 0 : i32
    return %c0_i32, %c0_i32_0 : i32, i32
  }
  func.func @transform_3(%arg0: i32) -> (i32, i32) {
    %c0_i32 = arith.constant 0 : i32
    %c0_i32_0 = arith.constant 0 : i32
    %c0_i32_1 = arith.constant 0 : i32
    return %c0_i32, %c0_i32_0 : i32, i32
  }
  func.func @transform_4(%arg0: i32) -> (i32, i32) {
    %c0_i32 = arith.constant 0 : i32
    %c0_i32_0 = arith.constant 0 : i32
    %c0_i32_1 = arith.constant 0 : i32
    return %c0_i32, %c0_i32_0 : i32, i32
  }
  func.func @transform_5(%arg0: i32) -> (i32, i32) {
    %c0_i32 = arith.constant 0 : i32
    %c0_i32_0 = arith.constant 0 : i32
    %c0_i32_1 = arith.constant 0 : i32
    return %c0_i32, %c0_i32_0 : i32, i32
  }
  func.func @transform_6(%arg0: i32) -> (i32, i32) {
    %c0_i32 = arith.constant 0 : i32
    %c0_i32_0 = arith.constant 0 : i32
    %c0_i32_1 = arith.constant 0 : i32
    return %c0_i32, %c0_i32_0 : i32, i32
  }
  func.func @transform_7(%arg0: i32) -> (i32, i32) {
    %c0_i32 = arith.constant 0 : i32
    %c0_i32_0 = arith.constant 0 : i32
    return %arg0, %c0_i32 : i32, i32
  }
}

</mosaic_0001>

<bundles_post_ra>
// kernel: simple_mlp_forward.1
= control target key start
LH: loop header
LB: loop body
LE: loop exit
PB: predicated region body
PF: predicated region fallthrough
CT: control target
= control target key end

     0   :  { %vm146_vm0 = vcmask 261120   ;;  %vm1444_vm1 = vcmask 130048   ;;  %s2744_s1 = inlined_call_operand.vmem [shape: bf16[32,128], index: 1, kind: input, shape index: {}]   ;;  %s2745_s0 = inlined_call_operand.vmem [shape: f32[512,32], index: 0, kind: input, shape index: {}]   ;;  %s2746_s3 = inlined_call_operand.vmem [shape: bf16[128,128], index: 3, kind: input, shape index: {}]   ;;  %s2747_s2 = inlined_call_operand.vmem [shape: f32[1,128], index: 2, kind: input, shape index: {}]   ;;  %s2748_s5 = inlined_call_operand.vmem [shape: bf16[128,16], index: 5, kind: input, shape index: {}]   ;;  %s2749_s4 = inlined_call_operand.vmem [shape: f32[1,128], index: 4, kind: input, shape index: {}]   ;;  %s2750_s6 = inlined_call_operand.vmem [shape: f32[1,16], index: 6, kind: input, shape index: {}]   ;;  %s2751_s7 = inlined_call_operand.vmem [shape: f32[512,16], index: 7, kind: output, shape index: {}]  }
   0x1   :  { %v1912_v0 = vld [vmem:[%s2744_s1] sm:$0xff]   ;;  %v1913_v1 = vld [vmem:[%s2744_s1 + $0x8] sm:$0xff]   ;;  %v29_v5 = vld [vmem:[%s2745_s0 + $0x10] sm:$0xff] }
   0x2   :  { %1680 = vmatprep.subr.bf16.mxu0 %v1912_v0  ;;  %v27_v2 = vld [vmem:[%s2745_s0] sm:$0xff]  ;;  %v28_v3 = vld [vmem:[%s2745_s0 + $0x8] sm:$0xff]  ;;  %1908 = vmatprep.subr.bf16.mxu1 %v1912_v0  ;;  %v30_v6 = vld [vmem:[%s2745_s0 + $0x18] sm:$0xff] }
   0x3   :  { %1681 = vmatpush3.bf16.msra.mxu0 %v1912_v0  ;;  %v91_v4 = vpack.c.bf16 %v28_v3, %v27_v2  ;;  %1910 = vmatpush3.bf16.msra.mxu1 %v1912_v0  ;;  %v31_v7 = vld [vmem:[%s2745_s0 + $0x20] sm:$0xff]  ;;  %v32_v8 = vld [vmem:[%s2745_s0 + $0x28] sm:$0xff]  ;;  %v92_v9 = vpack.c.bf16 %v30_v6, %v29_v5  ;;  %v33_v11 = vld [vmem:[%s2745_s0 + $0x30] sm:$0xff] }
   0x4   :  { %1682 = vmatprep.subr.bf16.mxu0 %v1913_v1  ;;  %1909 = vmatprep.subr.bf16.mxu1 %v1913_v1  ;;  %v93_v10 = vpack.c.bf16 %v32_v8, %v31_v7  ;;  %v34_v12 = vld [vmem:[%s2745_s0 + $0x38] sm:$0xff]  ;;  %v35_v13 = vld [vmem:[%s2745_s0 + $0x40] sm:$0xff]  ;;  %v36_v14 = vld [vmem:[%s2745_s0 + $0x48] sm:$0xff] }
   0x5   :  { %1684 = vmatprep.mubr.msk.bf16.mxu0 %vm146_vm0, %v91_v4  ;;  %v59_v15 = vld [vmem:[%s2745_s0 + $0x100] sm:$0xff]  ;;  %v60_v16 = vld [vmem:[%s2745_s0 + $0x108] sm:$0xff]  ;;  %v61_v17 = vld [vmem:[%s2745_s0 + $0x110] sm:$0xff]  ;;  %v94_v19 = vpack.c.bf16 %v34_v12, %v33_v11  ;;  %v95_v24 = vpack.c.bf16 %v36_v14, %v35_v13 }
   0x6   :  { %v62_v18 = vld [vmem:[%s2745_s0 + $0x118] sm:$0xff]  ;;  %v107_v20 = vpack.c.bf16 %v60_v16, %v59_v15  ;;  %v63_v22 = vld [vmem:[%s2745_s0 + $0x120] sm:$0xff]  ;;  %v64_v23 = vld [vmem:[%s2745_s0 + $0x128] sm:$0xff] }
   0x7   :  { %1683 = vmatpush3.bf16.msra.mxu0 %v1913_v1  ;;  %1911 = vmatpush3.bf16.msra.mxu1 %v1913_v1  ;;  %v108_v21 = vpack.c.bf16 %v62_v18, %v61_v17  ;;  %v109_v25 = vpack.c.bf16 %v64_v23, %v63_v22  ;;  %v37_v26 = vld [vmem:[%s2745_s0 + $0x50] sm:$0xff]  ;;  %v66_v28 = vld [vmem:[%s2745_s0 + $0x138] sm:$0xff]  ;;  %v67_v30 = vld [vmem:[%s2745_s0 + $0x140] sm:$0xff] }
   0x8   :  { %1716 = vmatprep.mubr.msk.bf16.mxu1 %vm146_vm0, %v107_v20  ;;  %v65_v27 = vld [vmem:[%s2745_s0 + $0x130] sm:$0xff]  ;;  %v38_v29 = vld [vmem:[%s2745_s0 + $0x58] sm:$0xff]  ;;  %v68_v31 = vld [vmem:[%s2745_s0 + $0x148] sm:$0xff] }
   0x9   :  { %v39_v32 = vld [vmem:[%s2745_s0 + $0x60] sm:$0xff]  ;;  %v40_v33 = vld [vmem:[%s2745_s0 + $0x68] sm:$0xff]  ;;  %v110_v34 = vpack.c.bf16 %v66_v28, %v65_v27  ;;  %v96_v35 = vpack.c.bf16 %v38_v29, %v37_v26  ;;  %v111_v36 = vpack.c.bf16 %v68_v31, %v67_v30  ;;  %v69_v38 = vld [vmem:[%s2745_s0 + $0x150] sm:$0xff] }
   0xa   :  { %1685 = vmatmul.mubr.msk.bf16.vlgmr.msra.gmra.mrb[0].mxu0 %vm146_vm0, %v92_v9  ;;  %1717 = vmatmul.mubr.msk.bf16.vlgmr.msra.gmra.mrb[0].mxu1 %vm146_vm0, %v108_v21  ;;  %v97_v37 = vpack.c.bf16 %v40_v33, %v39_v32  ;;  %v70_v39 = vld [vmem:[%s2745_s0 + $0x158] sm:$0xff]  ;;  %v1914_v40 = vld [vmem:[%s2746_s3] sm:$0xff]   ;;  %v41_v41 = vld [vmem:[%s2745_s0 + $0x70] sm:$0xff] }
   0xb   :  { %1688 = vmatprep.mubr.msk.bf16.mxu0 %vm146_vm0, %v93_v10  ;;  %1720 = vmatprep.mubr.msk.bf16.mxu1 %vm146_vm0, %v109_v25  ;;  %v42_v42 = vld [vmem:[%s2745_s0 + $0x78] sm:$0xff]  ;;  %v1915_v43 = vld [vmem:[%s2746_s3 + $0x8] sm:$0xff]   ;;  %v43_v44 = vld [vmem:[%s2745_s0 + $0x80] sm:$0xff]  ;;  %v112_v48 = vpack.c.bf16 %v70_v39, %v69_v38 }
   0xc   :  { %v71_v45 = vld [vmem:[%s2745_s0 + $0x160] sm:$0xff]  ;;  %v72_v46 = vld [vmem:[%s2745_s0 + $0x168] sm:$0xff]  ;;  %1748 = vmatprep.subr.bf16.mxu1 %v1914_v40  ;;  %v1916_v49 = vld [vmem:[%s2746_s3 + $0x10] sm:$0xff]   ;;  %v98_v50 = vpack.c.bf16 %v42_v42, %v41_v41 }
   0xd   :  { %v44_v47 = vld [vmem:[%s2745_s0 + $0x88] sm:$0xff]  ;;  %1749 = vmatpush3.bf16.msra.mxu1 %v1914_v40  ;;  %v113_v51 = vpack.c.bf16 %v72_v46, %v71_v45  ;;  %v1917_v53 = vld [vmem:[%s2746_s3 + $0x18] sm:$0xff]   ;;  %v45_v54 = vld [vmem:[%s2745_s0 + $0x90] sm:$0xff] }
   0xe   :  { %1750 = vmatprep.subr.bf16.mxu1 %v1915_v43  ;;  %v99_v52 = vpack.c.bf16 %v44_v47, %v43_v44  ;;  %v73_v55 = vld [vmem:[%s2745_s0 + $0x170] sm:$0xff]  ;;  %v74_v56 = vld [vmem:[%s2745_s0 + $0x178] sm:$0xff]  ;;  %v75_v58 = vld [vmem:[%s2745_s0 + $0x180] sm:$0xff] }
   0xf   :  { %v46_v57 = vld [vmem:[%s2745_s0 + $0x98] sm:$0xff]  ;;  %v76_v59 = vld [vmem:[%s2745_s0 + $0x188] sm:$0xff]  ;;  %v47_v60 = vld [vmem:[%s2745_s0 + $0xa0] sm:$0xff]  ;;  %v114_v62 = vpack.c.bf16 %v74_v56, %v73_v55 }
  0x10   :  { %v48_v61 = vld [vmem:[%s2745_s0 + $0xa8] sm:$0xff]  ;;  %v1918_v63 = vld [vmem:[%s2746_s3 + $0x20] sm:$0xff]   ;;  %v100_v0 = vpack.c.bf16 %v46_v57, %v45_v54  ;;  %v115_v1 = vpack.c.bf16 %v76_v59, %v75_v58  ;;  %v49_v4 = vld [vmem:[%s2745_s0 + $0xb0] sm:$0xff] }
  0x11   :  { %1751 = vmatpush3.bf16.msra.mxu1 %v1915_v43  ;;  %v101_v2 = vpack.c.bf16 %v48_v61, %v47_v60  ;;  %v1919_v3 = vld [vmem:[%s2746_s3 + $0x28] sm:$0xff]   ;;  %v77_v5 = vld [vmem:[%s2745_s0 + $0x190] sm:$0xff]  ;;  %v78_v6 = vld [vmem:[%s2745_s0 + $0x198] sm:$0xff] }
  0x12   :  { %1689 = vmatmul.mubr.msk.bf16.gmra.mrb[4].mxu0 %vm146_vm0, %v94_v19  ;;  %1721 = vmatmul.mubr.msk.bf16.gmra.mrb[4].mxu1 %vm146_vm0, %v110_v34  ;;  %v50_v7 = vld [vmem:[%s2745_s0 + $0xb8] sm:$0xff]  ;;  %v79_v8 = vld [vmem:[%s2745_s0 + $0x1a0] sm:$0xff]  ;;  %v80_v9 = vld [vmem:[%s2745_s0 + $0x1a8] sm:$0xff]  ;;  %v116_v12 = vpack.c.bf16 %v78_v6, %v77_v5 }
  0x13   :  { %1692 = vmatprep.mubr.msk.bf16.mxu0 %vm146_vm0, %v95_v24  ;;  %1724 = vmatprep.mubr.msk.bf16.mxu1 %vm146_vm0, %v111_v36  ;;  %v51_v10 = vld [vmem:[%s2745_s0 + $0xc0] sm:$0xff]  ;;  %v52_v11 = vld [vmem:[%s2745_s0 + $0xc8] sm:$0xff]  ;;  %v1920_v13 = vld [vmem:[%s2746_s3 + $0x30] sm:$0xff]   ;;  %v102_v14 = vpack.c.bf16 %v50_v7, %v49_v4  ;;  %v117_v15 = vpack.c.bf16 %v80_v9, %v79_v8 }
  0x14   :  { %1752 = vmatprep.subr.bf16.mxu1 %v1916_v49  ;;  %v103_v16 = vpack.c.bf16 %v52_v11, %v51_v10  ;;  %v53_v17 = vld [vmem:[%s2745_s0 + $0xd0] sm:$0xff]  ;;  %v82_v19 = vld [vmem:[%s2745_s0 + $0x1b8] sm:$0xff]  ;;  %v83_v21 = vld [vmem:[%s2745_s0 + $0x1c0] sm:$0xff] }
  0x15   :  { %1753 = vmatpush3.bf16.msra.mxu1 %v1916_v49  ;;  %v81_v18 = vld [vmem:[%s2745_s0 + $0x1b0] sm:$0xff]  ;;  %v54_v20 = vld [vmem:[%s2745_s0 + $0xd8] sm:$0xff]  ;;  %v84_v22 = vld [vmem:[%s2745_s0 + $0x1c8] sm:$0xff] }
  0x16   :  { %1754 = vmatprep.subr.bf16.mxu1 %v1917_v53  ;;  %v55_v23 = vld [vmem:[%s2745_s0 + $0xe0] sm:$0xff]  ;;  %v56_v24 = vld [vmem:[%s2745_s0 + $0xe8] sm:$0xff]  ;;  %v118_v25 = vpack.c.bf16 %v82_v19, %v81_v18  ;;  %v104_v26 = vpack.c.bf16 %v54_v20, %v53_v17  ;;  %v119_v27 = vpack.c.bf16 %v84_v22, %v83_v21  ;;  %v57_v29 = vld [vmem:[%s2745_s0 + $0xf0] sm:$0xff] }
  0x17   :  { %v105_v28 = vpack.c.bf16 %v56_v24, %v55_v23  ;;  %v85_v30 = vld [vmem:[%s2745_s0 + $0x1d0] sm:$0xff]  ;;  %v86_v31 = vld [vmem:[%s2745_s0 + $0x1d8] sm:$0xff]  ;;  %v87_v33 = vld [vmem:[%s2745_s0 + $0x1e0] sm:$0xff] }
  0x18   :  { %v58_v32 = vld [vmem:[%s2745_s0 + $0xf8] sm:$0xff]  ;;  %v88_v34 = vld [vmem:[%s2745_s0 + $0x1e8] sm:$0xff]  ;;  %v89_v38 = vld [vmem:[%s2745_s0 + $0x1f0] sm:$0xff] }
  0x19   :  { %1755 = vmatpush3.bf16.msra.mxu1 %v1917_v53  ;;  %v106_v36 = vpack.c.bf16 %v58_v32, %v57_v29  ;;  %v90_v39 = vld [vmem:[%s2745_s0 + $0x1f8] sm:$0xff]  ;;  %v2227_v42 = vld [vmem:[%s2747_s2] ss:$0 sm:$0xff]  ;;  %v1923_v54 = vld [vmem:[%s2748_s5 + $0x8] sm:$0xff]  }
  0x1a   :  { %1693 = vmatmul.mubr.msk.bf16.gmra.mrb[8].mxu0 %vm146_vm0, %v96_v35  ;;  %1725 = vmatmul.mubr.msk.bf16.gmra.mrb[8].mxu1 %vm146_vm0, %v112_v48  ;;  %v120_v35 = vpack.c.bf16 %v86_v31, %v85_v30  ;;  %v122_v40 = vpack.c.bf16 %v90_v39, %v89_v38  ;;  %v1921_v41 = vld [vmem:[%s2746_s3 + $0x38] sm:$0xff]   ;;  %v1924_v59 = vld [vmem:[%s2748_s5 + $0x10] sm:$0xff]   ;;  %v1926_v29 = vld [vmem:[%s2748_s5 + $0x20] sm:$0xff]  }
  0x1b   :  { %1696 = vmatprep.mubr.msk.bf16.mxu0 %vm146_vm0, %v97_v37  ;;  %1728 = vmatprep.mubr.msk.bf16.mxu1 %vm146_vm0, %v113_v51  ;;  %v121_v37 = vpack.c.bf16 %v88_v34, %v87_v33 }
  0x1c   :  { %1756 = vmatprep.subr.bf16.mxu1 %v1918_v63 }
  0x1d   :  { %1757 = vmatpush3.bf16.msra.mxu1 %v1918_v63 }
  0x1e   :  { %1758 = vmatprep.subr.bf16.mxu1 %v1919_v3 }
  0x21   :  { %1759 = vmatpush3.bf16.msra.mxu1 %v1919_v3 }
  0x22   :  { %1697 = vmatmul.mubr.msk.bf16.gmra.mrb[12].mxu0 %vm146_vm0, %v98_v50  ;;  %1729 = vmatmul.mubr.msk.bf16.gmra.mrb[12].mxu1 %vm146_vm0, %v114_v62 }
  0x23   :  { %1700 = vmatprep.mubr.msk.bf16.mxu0 %vm146_vm0, %v99_v52  ;;  %1732 = vmatprep.mubr.msk.bf16.mxu1 %vm146_vm0, %v115_v1  ;;  %v1922_v52 = vld [vmem:[%s2748_s5] sm:$0xff]  }
  0x24   :  { %1760 = vmatprep.subr.bf16.mxu1 %v1920_v13  ;;  %1828 = vmatprep.subr.bf16.mxu0 %v1922_v52 }
  0x25   :  { %1761 = vmatpush3.bf16.msra.mxu1 %v1920_v13  ;;  %1829 = vmatpush3.bf16.msra.mxu0 %v1922_v52 }
  0x26   :  { %1762 = vmatprep.subr.bf16.mxu1 %v1921_v41  ;;  %1830 = vmatprep.subr.bf16.mxu0 %v1923_v54 }
  0x29   :  { %1763 = vmatpush3.bf16.msra.mxu1 %v1921_v41  ;;  %1831 = vmatpush3.bf16.msra.mxu0 %v1923_v54 }
  0x2a   :  { %1701 = vmatmul.mubr.msk.bf16.gmra.mrb[16].mxu0 %vm146_vm0, %v100_v0  ;;  %1733 = vmatmul.mubr.msk.bf16.gmra.mrb[16].mxu1 %vm146_vm0, %v116_v12 }
  0x2b   :  { %1704 = vmatprep.mubr.msk.bf16.mxu0 %vm146_vm0, %v101_v2  ;;  %1736 = vmatprep.mubr.msk.bf16.mxu1 %vm146_vm0, %v117_v15  ;;  %v1925_v15 = vld [vmem:[%s2748_s5 + $0x18] sm:$0xff]  }
  0x2c   :  { %1832 = vmatprep.subr.bf16.mxu0 %v1924_v59 }
  0x2d   :  { %1833 = vmatpush3.bf16.msra.mxu0 %v1924_v59 }
  0x2e   :  { %1834 = vmatprep.subr.bf16.mxu0 %v1925_v15 }
  0x31   :  { %1835 = vmatpush3.bf16.msra.mxu0 %v1925_v15 }
  0x32   :  { %1705 = vmatmul.mubr.msk.bf16.gmra.mrb[20].mxu0 %vm146_vm0, %v102_v14  ;;  %1737 = vmatmul.mubr.msk.bf16.gmra.mrb[20].mxu1 %vm146_vm0, %v118_v25 }
  0x33   :  { %1708 = vmatprep.mubr.msk.bf16.mxu0 %vm146_vm0, %v103_v16  ;;  %1740 = vmatprep.mubr.msk.bf16.mxu1 %vm146_vm0, %v119_v27 }
  0x34   :  { %1836 = vmatprep.subr.bf16.mxu0 %v1926_v29 }
  0x35   :  { %1837 = vmatpush3.bf16.msra.mxu0 %v1926_v29 }
  0x3a   :  { %1709 = vmatmul.mubr.msk.bf16.gmra.mrb[24].mxu0 %vm146_vm0, %v104_v26  ;;  %1741 = vmatmul.mubr.msk.bf16.gmra.mrb[24].mxu1 %vm146_vm0, %v120_v35 }
  0x3b   :  { %1712 = vmatprep.mubr.msk.bf16.mxu0 %vm146_vm0, %v105_v28  ;;  %1744 = vmatprep.mubr.msk.bf16.mxu1 %vm146_vm0, %v121_v37 }
  0x42   :  { %1713 = vmatmul.mubr.msk.bf16.gmra.mrb[28].mxu0 %vm146_vm0, %v106_v36  ;;  %1745 = vmatmul.mubr.msk.bf16.gmra.mrb[28].mxu1 %vm146_vm0, %v122_v40 }
  0xdd   :  { %v1686_v43 = vpop.f32.mrb[0].mxu0  ;;  %v1718_v58 = vpop.f32.mrb[0].mxu1 }
  0xde   :  { %v286_v44 = vadd.f32 %v1686_v43, %v2227_v42  ;;  %v277_v45 = vpop.f32.mrb[1].mxu0  ;;  %v414_v62 = vadd.f32 %v1718_v58, %v2227_v42  ;;  %v405_v63 = vpop.f32.mrb[1].mxu1 }
  0xdf   :  { %v278_v46 = vadd.f32 %v2227_v42, %v277_v45  ;;  %v1687_v47 = vpop.f32.mrb[2].mxu0  ;;  %v406_v2 = vadd.f32 %v2227_v42, %v405_v63  ;;  %v1719_v3 = vpop.f32.mrb[2].mxu1 }
  0xe0   :  { %v289_v48 = vadd.f32 %v1687_v47, %v2227_v42  ;;  %v280_v49 = vpop.f32.mrb[3].mxu0  ;;  %v534_v50 = vmax.f32 %v286_v44, 0.0  ;;  %v566_v6 = vmax.f32 %v414_v62, 0.0  ;;  %v417_v7 = vadd.f32 %v1719_v3, %v2227_v42  ;;  %v408_v8 = vpop.f32.mrb[3].mxu1 }
  0xe1   :  { %v281_v51 = vadd.f32 %v2227_v42, %v280_v49  ;;  %v532_v55 = vmax.f32 %v278_v46, 0.0  ;;  %v564_v11 = vmax.f32 %v406_v2, 0.0  ;;  %v409_v12 = vadd.f32 %v2227_v42, %v408_v8  ;;  %v1927_v46 = vld [vmem:[%s2748_s5 + $0x28] sm:$0xff]  }
  0xe2   :  { %v535_v53 = vmax.f32 %v289_v48, 0.0  ;;  %v567_v14 = vmax.f32 %v417_v7, 0.0  ;;  %1838 = vmatprep.subr.bf16.mxu0 %v1927_v46 }
  0xe3   :  { %v533_v56 = vmax.f32 %v281_v51, 0.0  ;;  %v565_v18 = vmax.f32 %v409_v12, 0.0  ;;  %1839 = vmatpush3.bf16.msra.mxu0 %v1927_v46 }
  0xe4   :  { %v597_v57 = vpack.c.bf16 %v535_v53, %v534_v50  ;;  %v2253_v21 = vpack.c.bf16 %v567_v14, %v566_v6 }
  0xe5   :  { %v596_v60 = vpack.c.bf16 %v533_v56, %v532_v55  ;;  %v1690_v61 = vpop.f32.mrb[4].mxu0  ;;  %v2255_v23 = vpack.c.bf16 %v565_v18, %v564_v11  ;;  %v1722_v24 = vpop.f32.mrb[4].mxu1 }
  0xe6   :  { %v302_v0 = vadd.f32 %v1690_v61, %v2227_v42  ;;  %v293_v1 = vpop.f32.mrb[5].mxu0  ;;  %v430_v27 = vadd.f32 %v1722_v24, %v2227_v42  ;;  %v421_v28 = vpop.f32.mrb[5].mxu1 }
  0xe7   :  { %v294_v4 = vadd.f32 %v2227_v42, %v293_v1  ;;  %v1691_v5 = vpop.f32.mrb[6].mxu0  ;;  %1764 = vmatprep.mubr.bf16.mxu1 %v596_v60  ;;  %v422_v32 = vadd.f32 %v2227_v42, %v421_v28  ;;  %v1723_v33 = vpop.f32.mrb[6].mxu1  ;;  %v1928_v60 = vld [vmem:[%s2748_s5 + $0x30] sm:$0xff]  }
  0xe8   :  { %v305_v9 = vadd.f32 %v1691_v5, %v2227_v42  ;;  %v296_v10 = vpop.f32.mrb[7].mxu0  ;;  %1765 = vmatmul.mubr.bf16.vlgmr.msra.gmra.mrb[32].mxu1 %v597_v57  ;;  %v538_v16 = vmax.f32 %v302_v0, 0.0  ;;  %v570_v36 = vmax.f32 %v430_v27, 0.0  ;;  %v433_v37 = vadd.f32 %v1723_v33, %v2227_v42  ;;  %v424_v38 = vpop.f32.mrb[7].mxu1  ;;  %1840 = vmatprep.subr.bf16.mxu0 %v1928_v60 }
  0xe9   :  { %v297_v13 = vadd.f32 %v2227_v42, %v296_v10  ;;  %v536_v19 = vmax.f32 %v294_v4, 0.0  ;;  %v568_v41 = vmax.f32 %v422_v32, 0.0  ;;  %v425_v43 = vadd.f32 %v2227_v42, %v424_v38  ;;  %1841 = vmatpush3.bf16.msra.mxu0 %v1928_v60 }
  0xea   :  { %v539_v17 = vmax.f32 %v305_v9, 0.0  ;;  %v571_v45 = vmax.f32 %v433_v37, 0.0 }
  0xeb   :  { %v537_v20 = vmax.f32 %v297_v13, 0.0  ;;  %v569_v49 = vmax.f32 %v425_v43, 0.0 }
  0xec   :  { %v599_v22 = vpack.c.bf16 %v539_v17, %v538_v16  ;;  %v2271_v52 = vpack.c.bf16 %v571_v45, %v570_v36 }
  0xed   :  { %v598_v25 = vpack.c.bf16 %v537_v20, %v536_v19  ;;  %v1694_v26 = vpop.f32.mrb[8].mxu0  ;;  %v2273_v54 = vpack.c.bf16 %v569_v49, %v568_v41  ;;  %v1726_v55 = vpop.f32.mrb[8].mxu1 }
  0xee   :  { %v318_v30 = vadd.f32 %v1694_v26, %v2227_v42  ;;  %v309_v31 = vpop.f32.mrb[9].mxu0  ;;  %v446_v58 = vadd.f32 %v1726_v55, %v2227_v42  ;;  %v437_v59 = vpop.f32.mrb[9].mxu1 }
  0xef   :  { %v310_v34 = vadd.f32 %v2227_v42, %v309_v31  ;;  %v1695_v35 = vpop.f32.mrb[10].mxu0  ;;  %1768 = vmatprep.mubr.bf16.mxu1 %v598_v25  ;;  %v438_v63 = vadd.f32 %v2227_v42, %v437_v59  ;;  %v1727_v0 = vpop.f32.mrb[10].mxu1 }
  0xf0   :  { %v321_v39 = vadd.f32 %v1695_v35, %v2227_v42  ;;  %v312_v40 = vpop.f32.mrb[11].mxu0  ;;  %1769 = vmatmul.mubr.bf16.gmra.mrb[36].mxu1 %v599_v22  ;;  %v542_v47 = vmax.f32 %v318_v30, 0.0  ;;  %v574_v3 = vmax.f32 %v446_v58, 0.0  ;;  %v449_v4 = vadd.f32 %v1727_v0, %v2227_v42  ;;  %v440_v5 = vpop.f32.mrb[11].mxu1 }
  0xf1   :  { %v313_v44 = vadd.f32 %v2227_v42, %v312_v40  ;;  %v540_v50 = vmax.f32 %v310_v34, 0.0  ;;  %v572_v8 = vmax.f32 %v438_v63, 0.0  ;;  %v441_v9 = vadd.f32 %v2227_v42, %v440_v5 }
  0xf2   :  { %v543_v48 = vmax.f32 %v321_v39, 0.0  ;;  %v575_v11 = vmax.f32 %v449_v4, 0.0 }
  0xf3   :  { %v541_v51 = vmax.f32 %v313_v44, 0.0  ;;  %v573_v14 = vmax.f32 %v441_v9, 0.0 }
  0xf4   :  { %v601_v53 = vpack.c.bf16 %v543_v48, %v542_v47  ;;  %v2286_v17 = vpack.c.bf16 %v575_v11, %v574_v3 }
  0xf5   :  { %v600_v56 = vpack.c.bf16 %v541_v51, %v540_v50  ;;  %v1698_v57 = vpop.f32.mrb[12].mxu0  ;;  %v2288_v19 = vpack.c.bf16 %v573_v14, %v572_v8  ;;  %v1730_v20 = vpop.f32.mrb[12].mxu1 }
  0xf6   :  { %v334_v61 = vadd.f32 %v1698_v57, %v2227_v42  ;;  %v325_v62 = vpop.f32.mrb[13].mxu0  ;;  %v462_v25 = vadd.f32 %v1730_v20, %v2227_v42  ;;  %v453_v26 = vpop.f32.mrb[13].mxu1 }
  0xf7   :  { %v326_v1 = vadd.f32 %v2227_v42, %v325_v62  ;;  %v1699_v2 = vpop.f32.mrb[14].mxu0  ;;  %1772 = vmatprep.mubr.bf16.mxu1 %v600_v56  ;;  %v454_v29 = vadd.f32 %v2227_v42, %v453_v26  ;;  %v1731_v30 = vpop.f32.mrb[14].mxu1 }
  0xf8   :  { %v337_v6 = vadd.f32 %v1699_v2, %v2227_v42  ;;  %v328_v7 = vpop.f32.mrb[15].mxu0  ;;  %1773 = vmatmul.mubr.bf16.gmra.mrb[40].mxu1 %v601_v53  ;;  %v546_v12 = vmax.f32 %v334_v61, 0.0  ;;  %v578_v33 = vmax.f32 %v462_v25, 0.0  ;;  %v465_v34 = vadd.f32 %v1731_v30, %v2227_v42  ;;  %v456_v35 = vpop.f32.mrb[15].mxu1 }
  0xf9   :  { %v329_v10 = vadd.f32 %v2227_v42, %v328_v7  ;;  %v544_v15 = vmax.f32 %v326_v1, 0.0  ;;  %v576_v38 = vmax.f32 %v454_v29, 0.0  ;;  %v457_v39 = vadd.f32 %v2227_v42, %v456_v35 }
  0xfa   :  { %v547_v13 = vmax.f32 %v337_v6, 0.0  ;;  %v579_v41 = vmax.f32 %v465_v34, 0.0 }
  0xfb   :  { %v545_v16 = vmax.f32 %v329_v10, 0.0  ;;  %v577_v45 = vmax.f32 %v457_v39, 0.0 }
  0xfc   :  { %v603_v18 = vpack.c.bf16 %v547_v13, %v546_v12  ;;  %v2298_v48 = vpack.c.bf16 %v579_v41, %v578_v33 }
  0xfd   :  { %v602_v22 = vpack.c.bf16 %v545_v16, %v544_v15  ;;  %v1702_v24 = vpop.f32.mrb[16].mxu0  ;;  %v2300_v50 = vpack.c.bf16 %v577_v45, %v576_v38  ;;  %v1734_v51 = vpop.f32.mrb[16].mxu1 }
  0xfe   :  { %v350_v27 = vadd.f32 %v1702_v24, %v2227_v42  ;;  %v341_v28 = vpop.f32.mrb[17].mxu0  ;;  %v478_v56 = vadd.f32 %v1734_v51, %v2227_v42  ;;  %v469_v57 = vpop.f32.mrb[17].mxu1 }
  0xff   :  { %v342_v31 = vadd.f32 %v2227_v42, %v341_v28  ;;  %v1703_v32 = vpop.f32.mrb[18].mxu0  ;;  %1776 = vmatprep.mubr.bf16.mxu1 %v602_v22  ;;  %v470_v60 = vadd.f32 %v2227_v42, %v469_v57  ;;  %v1735_v61 = vpop.f32.mrb[18].mxu1 }
 0x100   :  { %v353_v36 = vadd.f32 %v1703_v32, %v2227_v42  ;;  %v344_v37 = vpop.f32.mrb[19].mxu0  ;;  %1777 = vmatmul.mubr.bf16.gmra.mrb[44].mxu1 %v603_v18  ;;  %v550_v43 = vmax.f32 %v350_v27, 0.0  ;;  %v582_v0 = vmax.f32 %v478_v56, 0.0  ;;  %v481_v1 = vadd.f32 %v1735_v61, %v2227_v42  ;;  %v472_v2 = vpop.f32.mrb[19].mxu1 }
 0x101   :  { %v345_v40 = vadd.f32 %v2227_v42, %v344_v37  ;;  %v548_v46 = vmax.f32 %v342_v31, 0.0  ;;  %v580_v5 = vmax.f32 %v470_v60, 0.0  ;;  %v473_v6 = vadd.f32 %v2227_v42, %v472_v2 }
 0x102   :  { %v551_v44 = vmax.f32 %v353_v36, 0.0  ;;  %v583_v8 = vmax.f32 %v481_v1, 0.0 }
 0x103   :  { %v549_v47 = vmax.f32 %v345_v40, 0.0  ;;  %v581_v11 = vmax.f32 %v473_v6, 0.0 }
 0x104   :  { %v605_v49 = vpack.c.bf16 %v551_v44, %v550_v43  ;;  %v2310_v14 = vpack.c.bf16 %v583_v8, %v582_v0 }
 0x105   :  { %v604_v53 = vpack.c.bf16 %v549_v47, %v548_v46  ;;  %v1706_v55 = vpop.f32.mrb[20].mxu0  ;;  %v2312_v16 = vpack.c.bf16 %v581_v11, %v580_v5  ;;  %v1738_v18 = vpop.f32.mrb[20].mxu1 }
 0x106   :  { %v366_v58 = vadd.f32 %v1706_v55, %v2227_v42  ;;  %v357_v59 = vpop.f32.mrb[21].mxu0  ;;  %v494_v24 = vadd.f32 %v1738_v18, %v2227_v42  ;;  %v485_v25 = vpop.f32.mrb[21].mxu1 }
 0x107   :  { %v358_v62 = vadd.f32 %v2227_v42, %v357_v59  ;;  %v1707_v63 = vpop.f32.mrb[22].mxu0  ;;  %1780 = vmatprep.mubr.bf16.mxu1 %v604_v53  ;;  %v486_v28 = vadd.f32 %v2227_v42, %v485_v25  ;;  %v1739_v29 = vpop.f32.mrb[22].mxu1 }
 0x108   :  { %v369_v3 = vadd.f32 %v1707_v63, %v2227_v42  ;;  %v360_v4 = vpop.f32.mrb[23].mxu0  ;;  %1781 = vmatmul.mubr.bf16.gmra.mrb[48].mxu1 %v605_v49  ;;  %v554_v9 = vmax.f32 %v366_v58, 0.0  ;;  %v586_v32 = vmax.f32 %v494_v24, 0.0  ;;  %v497_v33 = vadd.f32 %v1739_v29, %v2227_v42  ;;  %v488_v34 = vpop.f32.mrb[23].mxu1 }
 0x109   :  { %v361_v7 = vadd.f32 %v2227_v42, %v360_v4  ;;  %v552_v12 = vmax.f32 %v358_v62, 0.0  ;;  %v584_v37 = vmax.f32 %v486_v28, 0.0  ;;  %v489_v38 = vadd.f32 %v2227_v42, %v488_v34 }
 0x10a   :  { %v555_v10 = vmax.f32 %v369_v3, 0.0  ;;  %v587_v40 = vmax.f32 %v497_v33, 0.0 }
 0x10b   :  { %v553_v13 = vmax.f32 %v361_v7, 0.0  ;;  %v585_v44 = vmax.f32 %v489_v38, 0.0 }
 0x10c   :  { %v607_v15 = vpack.c.bf16 %v555_v10, %v554_v9  ;;  %v2322_v47 = vpack.c.bf16 %v587_v40, %v586_v32 }
 0x10d   :  { %v606_v20 = vpack.c.bf16 %v553_v13, %v552_v12  ;;  %v1710_v22 = vpop.f32.mrb[24].mxu0  ;;  %v622_v51 = vpack.c.bf16 %v585_v44, %v584_v37  ;;  %v1742_v53 = vpop.f32.mrb[24].mxu1 }
 0x10e   :  { %v382_v26 = vadd.f32 %v1710_v22, %v2227_v42  ;;  %v373_v27 = vpop.f32.mrb[25].mxu0  ;;  %v510_v57 = vadd.f32 %v1742_v53, %v2227_v42  ;;  %v501_v58 = vpop.f32.mrb[25].mxu1 }
 0x10f   :  { %v374_v30 = vadd.f32 %v2227_v42, %v373_v27  ;;  %v1711_v31 = vpop.f32.mrb[26].mxu0  ;;  %1784 = vmatprep.mubr.bf16.mxu1 %v606_v20  ;;  %v502_v61 = vadd.f32 %v2227_v42, %v501_v58  ;;  %v1743_v62 = vpop.f32.mrb[26].mxu1 }
 0x110   :  { %v385_v35 = vadd.f32 %v1711_v31, %v2227_v42  ;;  %v376_v36 = vpop.f32.mrb[27].mxu0  ;;  %1785 = vmatmul.mubr.bf16.gmra.mrb[52].mxu1 %v607_v15  ;;  %v558_v41 = vmax.f32 %v382_v26, 0.0  ;;  %v590_v1 = vmax.f32 %v510_v57, 0.0  ;;  %v513_v2 = vadd.f32 %v1743_v62, %v2227_v42  ;;  %v504_v3 = vpop.f32.mrb[27].mxu1 }
 0x111   :  { %v377_v39 = vadd.f32 %v2227_v42, %v376_v36  ;;  %v556_v45 = vmax.f32 %v374_v30, 0.0  ;;  %v588_v6 = vmax.f32 %v502_v61, 0.0  ;;  %v505_v7 = vadd.f32 %v2227_v42, %v504_v3 }
 0x112   :  { %v559_v43 = vmax.f32 %v385_v35, 0.0  ;;  %v591_v9 = vmax.f32 %v513_v2, 0.0 }
 0x113   :  { %v557_v46 = vmax.f32 %v377_v39, 0.0  ;;  %v589_v12 = vmax.f32 %v505_v7, 0.0 }
 0x114   :  { %v609_v49 = vpack.c.bf16 %v559_v43, %v558_v41  ;;  %v625_v18 = vpack.c.bf16 %v591_v9, %v590_v1 }
 0x115   :  { %v608_v55 = vpack.c.bf16 %v557_v46, %v556_v45  ;;  %v1714_v56 = vpop.f32.mrb[28].mxu0  ;;  %v624_v22 = vpack.c.bf16 %v589_v12, %v588_v6  ;;  %v1746_v24 = vpop.f32.mrb[28].mxu1 }
 0x116   :  { %v398_v59 = vadd.f32 %v1714_v56, %v2227_v42  ;;  %v389_v60 = vpop.f32.mrb[29].mxu0  ;;  %v526_v26 = vadd.f32 %v1746_v24, %v2227_v42  ;;  %v517_v27 = vpop.f32.mrb[29].mxu1 }
 0x117   :  { %v390_v63 = vadd.f32 %v2227_v42, %v389_v60  ;;  %v1715_v0 = vpop.f32.mrb[30].mxu0  ;;  %1788 = vmatprep.mubr.bf16.mxu1 %v608_v55  ;;  %v518_v28 = vadd.f32 %v2227_v42, %v517_v27  ;;  %v1747_v29 = vpop.f32.mrb[30].mxu1 }
 0x118   :  { %v401_v4 = vadd.f32 %v1715_v0, %v2227_v42  ;;  %v392_v5 = vpop.f32.mrb[31].mxu0  ;;  %1789 = vmatmul.mubr.bf16.gmra.mrb[56].mxu1 %v609_v49  ;;  %v562_v10 = vmax.f32 %v398_v59, 0.0  ;;  %v594_v30 = vmax.f32 %v526_v26, 0.0  ;;  %v529_v31 = vadd.f32 %v1747_v29, %v2227_v42  ;;  %v520_v32 = vpop.f32.mrb[31].mxu1 }
 0x119   :  { %v393_v8 = vadd.f32 %v2227_v42, %v392_v5  ;;  %v560_v13 = vmax.f32 %v390_v63, 0.0  ;;  %v592_v33 = vmax.f32 %v518_v28, 0.0  ;;  %v521_v34 = vadd.f32 %v2227_v42, %v520_v32  ;;  %v1929_v42 = vld [vmem:[%s2748_s5 + $0x38] sm:$0xff]  }
 0x11a   :  { %v563_v11 = vmax.f32 %v401_v4, 0.0  ;;  %v595_v35 = vmax.f32 %v529_v31, 0.0  ;;  %1842 = vmatprep.subr.bf16.mxu0 %v1929_v42 }
 0x11b   :  { %v561_v15 = vmax.f32 %v393_v8, 0.0  ;;  %v593_v36 = vmax.f32 %v521_v34, 0.0  ;;  %1843 = vmatpush3.bf16.msra.mxu0 %v1929_v42 }
 0x11c   :  { %v611_v20 = vpack.c.bf16 %v563_v11, %v562_v10  ;;  %v627_v37 = vpack.c.bf16 %v595_v35, %v594_v30 }
 0x11d   :  { %v610_v25 = vpack.c.bf16 %v561_v15, %v560_v13  ;;  %v626_v38 = vpack.c.bf16 %v593_v36, %v592_v33 }
 0x11f   :  { %1792 = vmatprep.mubr.bf16.mxu1 %v610_v25 }
 0x120   :  { %1793 = vmatmul.mubr.bf16.gmra.mrb[60].mxu1 %v611_v20 }
 0x121   :  { %1796 = vmatprep.mubr.bf16.mxu1 %v2255_v23 }
 0x128   :  { %1797 = vmatmul.mubr.bf16.gmra.mrb[64].mxu1 %v2253_v21  ;;  %v2353_v21 = vld [vmem:[%s2749_s4] ss:$0 sm:$0xff] }
 0x129   :  { %1800 = vmatprep.mubr.bf16.mxu1 %v2273_v54 }
 0x130   :  { %1801 = vmatmul.mubr.bf16.gmra.mrb[68].mxu1 %v2271_v52 }
 0x131   :  { %1804 = vmatprep.mubr.bf16.mxu1 %v2288_v19 }
 0x138   :  { %1805 = vmatmul.mubr.bf16.gmra.mrb[72].mxu1 %v2286_v17 }
 0x139   :  { %1808 = vmatprep.mubr.bf16.mxu1 %v2300_v50 }
 0x140   :  { %1809 = vmatmul.mubr.bf16.gmra.mrb[76].mxu1 %v2298_v48 }
 0x141   :  { %1812 = vmatprep.mubr.bf16.mxu1 %v2312_v16 }
 0x148   :  { %1813 = vmatmul.mubr.bf16.gmra.mrb[80].mxu1 %v2310_v14 }
 0x149   :  { %1816 = vmatprep.mubr.bf16.mxu1 %v622_v51 }
 0x150   :  { %1817 = vmatmul.mubr.bf16.gmra.mrb[84].mxu1 %v2322_v47 }
 0x151   :  { %1820 = vmatprep.mubr.bf16.mxu1 %v624_v22 }
 0x158   :  { %1821 = vmatmul.mubr.bf16.gmra.mrb[88].mxu1 %v625_v18 }
 0x159   :  { %1824 = vmatprep.mubr.bf16.mxu1 %v626_v38 }
 0x160   :  { %1825 = vmatmul.mubr.bf16.gmra.mrb[92].mxu1 %v627_v37 }
 0x1bb   :  { %v1766_v23 = vpop.f32.mrb[32].mxu1 }
 0x1bc   :  { %v742_v52 = vadd.f32 %v1766_v23, %v2353_v21  ;;  %v733_v54 = vpop.f32.mrb[33].mxu1 }
 0x1bd   :  { %v734_v17 = vadd.f32 %v2353_v21, %v733_v54  ;;  %v1767_v19 = vpop.f32.mrb[34].mxu1 }
 0x1be   :  { %v745_v48 = vadd.f32 %v1767_v19, %v2353_v21  ;;  %v736_v50 = vpop.f32.mrb[35].mxu1  ;;  %v990_v16 = vmax.f32 %v742_v52, 0.0 }
 0x1bf   :  { %v737_v14 = vadd.f32 %v2353_v21, %v736_v50  ;;  %v988_v40 = vmax.f32 %v734_v17, 0.0 }
 0x1c0   :  { %v991_v39 = vmax.f32 %v745_v48, 0.0 }
 0x1c1   :  { %v989_v41 = vmax.f32 %v737_v14, 0.0 }
 0x1c2   :  { %v1053_v43 = vpack.c.bf16 %v991_v39, %v990_v16 }
 0x1c3   :  { %v1052_v44 = vpack.c.bf16 %v989_v41, %v988_v40  ;;  %v1770_v45 = vpop.f32.mrb[36].mxu1 }
 0x1c4   :  { %v758_v46 = vadd.f32 %v1770_v45, %v2353_v21  ;;  %v749_v47 = vpop.f32.mrb[37].mxu1 }
 0x1c5   :  { %v750_v49 = vadd.f32 %v2353_v21, %v749_v47  ;;  %v1771_v51 = vpop.f32.mrb[38].mxu1  ;;  %1844 = vmatprep.mubr.bf16.mxu0 %v1052_v44 }
 0x1c6   :  { %v761_v53 = vadd.f32 %v1771_v51, %v2353_v21  ;;  %v752_v55 = vpop.f32.mrb[39].mxu1  ;;  %1845 = vmatmul.mubr.bf16.vlgmr.msra.gmra.mrb[32].mxu0 %v1053_v43  ;;  %v994_v57 = vmax.f32 %v758_v46, 0.0 }
 0x1c7   :  { %v753_v56 = vadd.f32 %v2353_v21, %v752_v55  ;;  %v992_v59 = vmax.f32 %v750_v49, 0.0 }
 0x1c8   :  { %v995_v58 = vmax.f32 %v761_v53, 0.0 }
 0x1c9   :  { %v993_v60 = vmax.f32 %v753_v56, 0.0 }
 0x1ca   :  { %v1055_v61 = vpack.c.bf16 %v995_v58, %v994_v57 }
 0x1cb   :  { %v1054_v62 = vpack.c.bf16 %v993_v60, %v992_v59  ;;  %v1774_v63 = vpop.f32.mrb[40].mxu1 }
 0x1cc   :  { %v774_v0 = vadd.f32 %v1774_v63, %v2353_v21  ;;  %v765_v1 = vpop.f32.mrb[41].mxu1 }
 0x1cd   :  { %v766_v2 = vadd.f32 %v2353_v21, %v765_v1  ;;  %v1775_v3 = vpop.f32.mrb[42].mxu1  ;;  %1848 = vmatprep.mubr.bf16.mxu0 %v1054_v62 }
 0x1ce   :  { %v777_v4 = vadd.f32 %v1775_v3, %v2353_v21  ;;  %v768_v5 = vpop.f32.mrb[43].mxu1  ;;  %1849 = vmatmul.mubr.bf16.gmra.mrb[36].mxu0 %v1055_v61  ;;  %v998_v7 = vmax.f32 %v774_v0, 0.0 }
 0x1cf   :  { %v769_v6 = vadd.f32 %v2353_v21, %v768_v5  ;;  %v996_v9 = vmax.f32 %v766_v2, 0.0 }
 0x1d0   :  { %v999_v8 = vmax.f32 %v777_v4, 0.0 }
 0x1d1   :  { %v997_v10 = vmax.f32 %v769_v6, 0.0 }
 0x1d2   :  { %v1057_v11 = vpack.c.bf16 %v999_v8, %v998_v7 }
 0x1d3   :  { %v1056_v12 = vpack.c.bf16 %v997_v10, %v996_v9  ;;  %v1778_v13 = vpop.f32.mrb[44].mxu1 }
 0x1d4   :  { %v790_v15 = vadd.f32 %v1778_v13, %v2353_v21  ;;  %v781_v18 = vpop.f32.mrb[45].mxu1 }
 0x1d5   :  { %v782_v20 = vadd.f32 %v2353_v21, %v781_v18  ;;  %v1779_v22 = vpop.f32.mrb[46].mxu1  ;;  %1852 = vmatprep.mubr.bf16.mxu0 %v1056_v12 }
 0x1d6   :  { %v793_v24 = vadd.f32 %v1779_v22, %v2353_v21  ;;  %v784_v25 = vpop.f32.mrb[47].mxu1  ;;  %1853 = vmatmul.mubr.bf16.gmra.mrb[40].mxu0 %v1057_v11  ;;  %v1002_v27 = vmax.f32 %v790_v15, 0.0 }
 0x1d7   :  { %v785_v26 = vadd.f32 %v2353_v21, %v784_v25  ;;  %v1000_v29 = vmax.f32 %v782_v20, 0.0 }
 0x1d8   :  { %v1003_v28 = vmax.f32 %v793_v24, 0.0 }
 0x1d9   :  { %v1001_v30 = vmax.f32 %v785_v26, 0.0 }
 0x1da   :  { %v1059_v31 = vpack.c.bf16 %v1003_v28, %v1002_v27 }
 0x1db   :  { %v1058_v32 = vpack.c.bf16 %v1001_v30, %v1000_v29  ;;  %v1782_v33 = vpop.f32.mrb[48].mxu1 }
 0x1dc   :  { %v806_v34 = vadd.f32 %v1782_v33, %v2353_v21  ;;  %v797_v35 = vpop.f32.mrb[49].mxu1 }
 0x1dd   :  { %v798_v36 = vadd.f32 %v2353_v21, %v797_v35  ;;  %v1783_v37 = vpop.f32.mrb[50].mxu1  ;;  %1856 = vmatprep.mubr.bf16.mxu0 %v1058_v32 }
 0x1de   :  { %v809_v38 = vadd.f32 %v1783_v37, %v2353_v21  ;;  %v800_v42 = vpop.f32.mrb[51].mxu1  ;;  %1857 = vmatmul.mubr.bf16.gmra.mrb[44].mxu0 %v1059_v31  ;;  %v1006_v52 = vmax.f32 %v806_v34, 0.0 }
 0x1df   :  { %v801_v23 = vadd.f32 %v2353_v21, %v800_v42  ;;  %v1004_v17 = vmax.f32 %v798_v36, 0.0 }
 0x1e0   :  { %v1007_v54 = vmax.f32 %v809_v38, 0.0 }
 0x1e1   :  { %v1005_v19 = vmax.f32 %v801_v23, 0.0 }
 0x1e2   :  { %v1061_v48 = vpack.c.bf16 %v1007_v54, %v1006_v52 }
 0x1e3   :  { %v1060_v50 = vpack.c.bf16 %v1005_v19, %v1004_v17  ;;  %v1786_v14 = vpop.f32.mrb[52].mxu1 }
 0x1e4   :  { %v822_v16 = vadd.f32 %v1786_v14, %v2353_v21  ;;  %v813_v39 = vpop.f32.mrb[53].mxu1 }
 0x1e5   :  { %v814_v40 = vadd.f32 %v2353_v21, %v813_v39  ;;  %v1787_v41 = vpop.f32.mrb[54].mxu1  ;;  %1860 = vmatprep.mubr.bf16.mxu0 %v1060_v50 }
 0x1e6   :  { %v825_v43 = vadd.f32 %v1787_v41, %v2353_v21  ;;  %v816_v44 = vpop.f32.mrb[55].mxu1  ;;  %1861 = vmatmul.mubr.bf16.gmra.mrb[48].mxu0 %v1061_v48  ;;  %v1010_v46 = vmax.f32 %v822_v16, 0.0 }
 0x1e7   :  { %v817_v45 = vadd.f32 %v2353_v21, %v816_v44  ;;  %v1008_v49 = vmax.f32 %v814_v40, 0.0 }
 0x1e8   :  { %v1011_v47 = vmax.f32 %v825_v43, 0.0 }
 0x1e9   :  { %v1009_v51 = vmax.f32 %v817_v45, 0.0 }
 0x1ea   :  { %v1063_v53 = vpack.c.bf16 %v1011_v47, %v1010_v46 }
 0x1eb   :  { %v1062_v55 = vpack.c.bf16 %v1009_v51, %v1008_v49  ;;  %v1790_v56 = vpop.f32.mrb[56].mxu1 }
 0x1ec   :  { %v838_v57 = vadd.f32 %v1790_v56, %v2353_v21  ;;  %v829_v58 = vpop.f32.mrb[57].mxu1 }
 0x1ed   :  { %v830_v59 = vadd.f32 %v2353_v21, %v829_v58  ;;  %v1791_v60 = vpop.f32.mrb[58].mxu1  ;;  %1864 = vmatprep.mubr.bf16.mxu0 %v1062_v55 }
 0x1ee   :  { %v841_v61 = vadd.f32 %v1791_v60, %v2353_v21  ;;  %v832_v62 = vpop.f32.mrb[59].mxu1  ;;  %1865 = vmatmul.mubr.bf16.gmra.mrb[52].mxu0 %v1063_v53  ;;  %v1014_v0 = vmax.f32 %v838_v57, 0.0 }
 0x1ef   :  { %v833_v63 = vadd.f32 %v2353_v21, %v832_v62  ;;  %v1012_v2 = vmax.f32 %v830_v59, 0.0 }
 0x1f0   :  { %v1015_v1 = vmax.f32 %v841_v61, 0.0 }
 0x1f1   :  { %v1013_v3 = vmax.f32 %v833_v63, 0.0 }
 0x1f2   :  { %v1065_v4 = vpack.c.bf16 %v1015_v1, %v1014_v0 }
 0x1f3   :  { %v1064_v5 = vpack.c.bf16 %v1013_v3, %v1012_v2  ;;  %v1794_v6 = vpop.f32.mrb[60].mxu1 }
 0x1f4   :  { %v854_v7 = vadd.f32 %v1794_v6, %v2353_v21  ;;  %v845_v8 = vpop.f32.mrb[61].mxu1 }
 0x1f5   :  { %v846_v9 = vadd.f32 %v2353_v21, %v845_v8  ;;  %v1795_v10 = vpop.f32.mrb[62].mxu1  ;;  %1868 = vmatprep.mubr.bf16.mxu0 %v1064_v5 }
 0x1f6   :  { %v857_v11 = vadd.f32 %v1795_v10, %v2353_v21  ;;  %v848_v12 = vpop.f32.mrb[63].mxu1  ;;  %1869 = vmatmul.mubr.bf16.gmra.mrb[56].mxu0 %v1065_v4  ;;  %v1018_v15 = vmax.f32 %v854_v7, 0.0 }
 0x1f7   :  { %v849_v13 = vadd.f32 %v2353_v21, %v848_v12  ;;  %v1016_v20 = vmax.f32 %v846_v9, 0.0 }
 0x1f8   :  { %v1019_v18 = vmax.f32 %v857_v11, 0.0 }
 0x1f9   :  { %v1017_v22 = vmax.f32 %v849_v13, 0.0 }
 0x1fa   :  { %v1067_v24 = vpack.c.bf16 %v1019_v18, %v1018_v15 }
 0x1fb   :  { %v1066_v25 = vpack.c.bf16 %v1017_v22, %v1016_v20  ;;  %v1798_v26 = vpop.f32.mrb[64].mxu1 }
 0x1fc   :  { %v870_v27 = vadd.f32 %v1798_v26, %v2353_v21  ;;  %v861_v28 = vpop.f32.mrb[65].mxu1 }
 0x1fd   :  { %v862_v29 = vadd.f32 %v2353_v21, %v861_v28  ;;  %v1799_v30 = vpop.f32.mrb[66].mxu1  ;;  %1872 = vmatprep.mubr.bf16.mxu0 %v1066_v25 }
 0x1fe   :  { %v873_v31 = vadd.f32 %v1799_v30, %v2353_v21  ;;  %v864_v32 = vpop.f32.mrb[67].mxu1  ;;  %1873 = vmatmul.mubr.bf16.gmra.mrb[60].mxu0 %v1067_v24  ;;  %v1022_v34 = vmax.f32 %v870_v27, 0.0 }
 0x1ff   :  { %v865_v33 = vadd.f32 %v2353_v21, %v864_v32  ;;  %v1020_v36 = vmax.f32 %v862_v29, 0.0 }
 0x200   :  { %v1023_v35 = vmax.f32 %v873_v31, 0.0 }
 0x201   :  { %v1021_v37 = vmax.f32 %v865_v33, 0.0 }
 0x202   :  { %v1069_v38 = vpack.c.bf16 %v1023_v35, %v1022_v34 }
 0x203   :  { %v1068_v42 = vpack.c.bf16 %v1021_v37, %v1020_v36  ;;  %v1802_v23 = vpop.f32.mrb[68].mxu1 }
 0x204   :  { %v886_v52 = vadd.f32 %v1802_v23, %v2353_v21  ;;  %v877_v54 = vpop.f32.mrb[69].mxu1 }
 0x205   :  { %v878_v17 = vadd.f32 %v2353_v21, %v877_v54  ;;  %v1803_v19 = vpop.f32.mrb[70].mxu1  ;;  %1876 = vmatprep.mubr.bf16.mxu0 %v1068_v42 }
 0x206   :  { %v889_v48 = vadd.f32 %v1803_v19, %v2353_v21  ;;  %v880_v50 = vpop.f32.mrb[71].mxu1  ;;  %1877 = vmatmul.mubr.bf16.gmra.mrb[64].mxu0 %v1069_v38  ;;  %v1026_v16 = vmax.f32 %v886_v52, 0.0 }
 0x207   :  { %v881_v14 = vadd.f32 %v2353_v21, %v880_v50  ;;  %v1024_v40 = vmax.f32 %v878_v17, 0.0 }
 0x208   :  { %v1027_v39 = vmax.f32 %v889_v48, 0.0 }
 0x209   :  { %v1025_v41 = vmax.f32 %v881_v14, 0.0 }
 0x20a   :  { %v1071_v43 = vpack.c.bf16 %v1027_v39, %v1026_v16 }
 0x20b   :  { %v1070_v44 = vpack.c.bf16 %v1025_v41, %v1024_v40  ;;  %v1806_v45 = vpop.f32.mrb[72].mxu1 }
 0x20c   :  { %v902_v46 = vadd.f32 %v1806_v45, %v2353_v21  ;;  %v893_v47 = vpop.f32.mrb[73].mxu1 }
 0x20d   :  { %v894_v49 = vadd.f32 %v2353_v21, %v893_v47  ;;  %v1807_v51 = vpop.f32.mrb[74].mxu1  ;;  %1880 = vmatprep.mubr.bf16.mxu0 %v1070_v44 }
 0x20e   :  { %v905_v53 = vadd.f32 %v1807_v51, %v2353_v21  ;;  %v896_v55 = vpop.f32.mrb[75].mxu1  ;;  %1881 = vmatmul.mubr.bf16.gmra.mrb[68].mxu0 %v1071_v43  ;;  %v1030_v57 = vmax.f32 %v902_v46, 0.0 }
 0x20f   :  { %v897_v56 = vadd.f32 %v2353_v21, %v896_v55  ;;  %v1028_v59 = vmax.f32 %v894_v49, 0.0 }
 0x210   :  { %v1031_v58 = vmax.f32 %v905_v53, 0.0 }
 0x211   :  { %v1029_v60 = vmax.f32 %v897_v56, 0.0 }
 0x212   :  { %v1073_v61 = vpack.c.bf16 %v1031_v58, %v1030_v57 }
 0x213   :  { %v1072_v62 = vpack.c.bf16 %v1029_v60, %v1028_v59  ;;  %v1810_v63 = vpop.f32.mrb[76].mxu1 }
 0x214   :  { %v918_v0 = vadd.f32 %v1810_v63, %v2353_v21  ;;  %v909_v1 = vpop.f32.mrb[77].mxu1 }
 0x215   :  { %v910_v2 = vadd.f32 %v2353_v21, %v909_v1  ;;  %v1811_v3 = vpop.f32.mrb[78].mxu1  ;;  %1884 = vmatprep.mubr.bf16.mxu0 %v1072_v62 }
 0x216   :  { %v921_v4 = vadd.f32 %v1811_v3, %v2353_v21  ;;  %v912_v5 = vpop.f32.mrb[79].mxu1  ;;  %1885 = vmatmul.mubr.bf16.gmra.mrb[72].mxu0 %v1073_v61  ;;  %v1034_v7 = vmax.f32 %v918_v0, 0.0 }
 0x217   :  { %v913_v6 = vadd.f32 %v2353_v21, %v912_v5  ;;  %v1032_v9 = vmax.f32 %v910_v2, 0.0 }
 0x218   :  { %v1035_v8 = vmax.f32 %v921_v4, 0.0 }
 0x219   :  { %v1033_v10 = vmax.f32 %v913_v6, 0.0  ;;  %v2422_v6 = vld [vmem:[%s2750_s6] ss:$0 sm:$0xff] }
 0x21a   :  { %v1075_v11 = vpack.c.bf16 %v1035_v8, %v1034_v7 }
 0x21b   :  { %v1074_v12 = vpack.c.bf16 %v1033_v10, %v1032_v9  ;;  %v1814_v13 = vpop.f32.mrb[80].mxu1 }
 0x21c   :  { %v934_v15 = vadd.f32 %v1814_v13, %v2353_v21  ;;  %v925_v18 = vpop.f32.mrb[81].mxu1 }
 0x21d   :  { %v926_v20 = vadd.f32 %v2353_v21, %v925_v18  ;;  %v1815_v22 = vpop.f32.mrb[82].mxu1  ;;  %1888 = vmatprep.mubr.bf16.mxu0 %v1074_v12 }
 0x21e   :  { %v937_v24 = vadd.f32 %v1815_v22, %v2353_v21  ;;  %v928_v25 = vpop.f32.mrb[83].mxu1  ;;  %1889 = vmatmul.mubr.bf16.gmra.mrb[76].mxu0 %v1075_v11  ;;  %v1038_v27 = vmax.f32 %v934_v15, 0.0 }
 0x21f   :  { %v929_v26 = vadd.f32 %v2353_v21, %v928_v25  ;;  %v1036_v29 = vmax.f32 %v926_v20, 0.0 }
 0x220   :  { %v1039_v28 = vmax.f32 %v937_v24, 0.0 }
 0x221   :  { %v1037_v30 = vmax.f32 %v929_v26, 0.0 }
 0x222   :  { %v1077_v31 = vpack.c.bf16 %v1039_v28, %v1038_v27 }
 0x223   :  { %v1076_v32 = vpack.c.bf16 %v1037_v30, %v1036_v29  ;;  %v1818_v33 = vpop.f32.mrb[84].mxu1 }
 0x224   :  { %v950_v34 = vadd.f32 %v1818_v33, %v2353_v21  ;;  %v941_v35 = vpop.f32.mrb[85].mxu1 }
 0x225   :  { %v942_v36 = vadd.f32 %v2353_v21, %v941_v35  ;;  %v1819_v37 = vpop.f32.mrb[86].mxu1  ;;  %1892 = vmatprep.mubr.bf16.mxu0 %v1076_v32 }
 0x226   :  { %v953_v38 = vadd.f32 %v1819_v37, %v2353_v21  ;;  %v944_v42 = vpop.f32.mrb[87].mxu1  ;;  %1893 = vmatmul.mubr.bf16.gmra.mrb[80].mxu0 %v1077_v31  ;;  %v1042_v52 = vmax.f32 %v950_v34, 0.0 }
 0x227   :  { %v945_v23 = vadd.f32 %v2353_v21, %v944_v42  ;;  %v1040_v17 = vmax.f32 %v942_v36, 0.0 }
 0x228   :  { %v1043_v54 = vmax.f32 %v953_v38, 0.0 }
 0x229   :  { %v1041_v19 = vmax.f32 %v945_v23, 0.0 }
 0x22a   :  { %v1079_v48 = vpack.c.bf16 %v1043_v54, %v1042_v52 }
 0x22b   :  { %v1078_v50 = vpack.c.bf16 %v1041_v19, %v1040_v17  ;;  %v1822_v14 = vpop.f32.mrb[88].mxu1 }
 0x22c   :  { %v966_v16 = vadd.f32 %v1822_v14, %v2353_v21  ;;  %v957_v39 = vpop.f32.mrb[89].mxu1 }
 0x22d   :  { %v958_v40 = vadd.f32 %v2353_v21, %v957_v39  ;;  %v1823_v41 = vpop.f32.mrb[90].mxu1  ;;  %1896 = vmatprep.mubr.bf16.mxu0 %v1078_v50 }
 0x22e   :  { %v969_v43 = vadd.f32 %v1823_v41, %v2353_v21  ;;  %v960_v44 = vpop.f32.mrb[91].mxu1  ;;  %1897 = vmatmul.mubr.bf16.gmra.mrb[84].mxu0 %v1079_v48  ;;  %v1046_v46 = vmax.f32 %v966_v16, 0.0 }
 0x22f   :  { %v961_v45 = vadd.f32 %v2353_v21, %v960_v44  ;;  %v1044_v49 = vmax.f32 %v958_v40, 0.0 }
 0x230   :  { %v1047_v47 = vmax.f32 %v969_v43, 0.0 }
 0x231   :  { %v1045_v51 = vmax.f32 %v961_v45, 0.0 }
 0x232   :  { %v1081_v53 = vpack.c.bf16 %v1047_v47, %v1046_v46 }
 0x233   :  { %v1080_v55 = vpack.c.bf16 %v1045_v51, %v1044_v49  ;;  %v1826_v56 = vpop.f32.mrb[92].mxu1 }
 0x234   :  { %v982_v57 = vadd.f32 %v1826_v56, %v2353_v21  ;;  %v973_v58 = vpop.f32.mrb[93].mxu1 }
 0x235   :  { %v974_v59 = vadd.f32 %v2353_v21, %v973_v58  ;;  %v1827_v60 = vpop.f32.mrb[94].mxu1  ;;  %1900 = vmatprep.mubr.bf16.mxu0 %v1080_v55 }
 0x236   :  { %v985_v61 = vadd.f32 %v1827_v60, %v2353_v21  ;;  %v976_v62 = vpop.f32.mrb[95].mxu1  ;;  %1901 = vmatmul.mubr.bf16.gmra.mrb[88].mxu0 %v1081_v53  ;;  %v1050_v0 = vmax.f32 %v982_v57, 0.0 }
 0x237   :  { %v977_v63 = vadd.f32 %v2353_v21, %v976_v62  ;;  %v1048_v2 = vmax.f32 %v974_v59, 0.0 }
 0x238   :  { %v1051_v1 = vmax.f32 %v985_v61, 0.0 }
 0x239   :  { %v1049_v3 = vmax.f32 %v977_v63, 0.0 }
 0x23a   :  { %v1083_v4 = vpack.c.bf16 %v1051_v1, %v1050_v0 }
 0x23b   :  { %v1082_v5 = vpack.c.bf16 %v1049_v3, %v1048_v2 }
 0x23d   :  { %1904 = vmatprep.mubr.bf16.mxu0 %v1082_v5 }
 0x23e   :  { %1905 = vmatmul.mubr.bf16.gmra.mrb[92].mxu0 %v1083_v4 }
 0x299   :  { %v1846_v7 = vpop.f32.mrb[32].mxu0 }
 0x29a   :  { %v1198_v8 = vadd.f32 %v1846_v7, %v2422_v6  ;;  %v1189_v9 = vpop.f32.mrb[33].mxu0 }
 0x29b   :  { %v1190_v21 = vadd.f32 %v2422_v6, %v1189_v9  ;;  %v1847_v10 = vpop.f32.mrb[34].mxu0 }
 0x29c   :  { %1447 = vst.msk [vmem:[%s2751_s7 + $0x10] sm:$0xff] %vm1444_vm1, %v1198_v8  ;;  %v1201_v11 = vadd.f32 %v1847_v10, %v2422_v6  ;;  %v1192_v12 = vpop.f32.mrb[35].mxu0 }
 0x29d   :  { %1445 = vst.msk [vmem:[%s2751_s7] sm:$0xff] %vm1444_vm1, %v1190_v21  ;;  %v1193_v13 = vadd.f32 %v2422_v6, %v1192_v12 }
 0x29e   :  { %1448 = vst.msk [vmem:[%s2751_s7 + $0x18] sm:$0xff] %vm1444_vm1, %v1201_v11 }
 0x29f   :  { %1446 = vst.msk [vmem:[%s2751_s7 + $0x8] sm:$0xff] %vm1444_vm1, %v1193_v13 }
 0x2a1   :  { %v1850_v15 = vpop.f32.mrb[36].mxu0 }
 0x2a2   :  { %v1214_v18 = vadd.f32 %v1850_v15, %v2422_v6  ;;  %v1205_v20 = vpop.f32.mrb[37].mxu0 }
 0x2a3   :  { %v1206_v22 = vadd.f32 %v2422_v6, %v1205_v20  ;;  %v1851_v24 = vpop.f32.mrb[38].mxu0 }
 0x2a4   :  { %1451 = vst.msk [vmem:[%s2751_s7 + $0x30] sm:$0xff] %vm1444_vm1, %v1214_v18  ;;  %v1217_v25 = vadd.f32 %v1851_v24, %v2422_v6  ;;  %v1208_v26 = vpop.f32.mrb[39].mxu0 }
 0x2a5   :  { %1449 = vst.msk [vmem:[%s2751_s7 + $0x20] sm:$0xff] %vm1444_vm1, %v1206_v22  ;;  %v1209_v27 = vadd.f32 %v2422_v6, %v1208_v26 }
 0x2a6   :  { %1452 = vst.msk [vmem:[%s2751_s7 + $0x38] sm:$0xff] %vm1444_vm1, %v1217_v25 }
 0x2a7   :  { %1450 = vst.msk [vmem:[%s2751_s7 + $0x28] sm:$0xff] %vm1444_vm1, %v1209_v27 }
 0x2a9   :  { %v1854_v28 = vpop.f32.mrb[40].mxu0 }
 0x2aa   :  { %v1230_v29 = vadd.f32 %v1854_v28, %v2422_v6  ;;  %v1221_v30 = vpop.f32.mrb[41].mxu0 }
 0x2ab   :  { %v1222_v31 = vadd.f32 %v2422_v6, %v1221_v30  ;;  %v1855_v32 = vpop.f32.mrb[42].mxu0 }
 0x2ac   :  { %1455 = vst.msk [vmem:[%s2751_s7 + $0x50] sm:$0xff] %vm1444_vm1, %v1230_v29  ;;  %v1233_v33 = vadd.f32 %v1855_v32, %v2422_v6  ;;  %v1224_v34 = vpop.f32.mrb[43].mxu0 }
 0x2ad   :  { %1453 = vst.msk [vmem:[%s2751_s7 + $0x40] sm:$0xff] %vm1444_vm1, %v1222_v31  ;;  %v1225_v35 = vadd.f32 %v2422_v6, %v1224_v34 }
 0x2ae   :  { %1456 = vst.msk [vmem:[%s2751_s7 + $0x58] sm:$0xff] %vm1444_vm1, %v1233_v33 }
 0x2af   :  { %1454 = vst.msk [vmem:[%s2751_s7 + $0x48] sm:$0xff] %vm1444_vm1, %v1225_v35 }
 0x2b1   :  { %v1858_v36 = vpop.f32.mrb[44].mxu0 }
 0x2b2   :  { %v1246_v37 = vadd.f32 %v1858_v36, %v2422_v6  ;;  %v1237_v38 = vpop.f32.mrb[45].mxu0 }
 0x2b3   :  { %v1238_v42 = vadd.f32 %v2422_v6, %v1237_v38  ;;  %v1859_v23 = vpop.f32.mrb[46].mxu0 }
 0x2b4   :  { %1459 = vst.msk [vmem:[%s2751_s7 + $0x70] sm:$0xff] %vm1444_vm1, %v1246_v37  ;;  %v1249_v52 = vadd.f32 %v1859_v23, %v2422_v6  ;;  %v1240_v54 = vpop.f32.mrb[47].mxu0 }
 0x2b5   :  { %1457 = vst.msk [vmem:[%s2751_s7 + $0x60] sm:$0xff] %vm1444_vm1, %v1238_v42  ;;  %v1241_v17 = vadd.f32 %v2422_v6, %v1240_v54 }
 0x2b6   :  { %1460 = vst.msk [vmem:[%s2751_s7 + $0x78] sm:$0xff] %vm1444_vm1, %v1249_v52 }
 0x2b7   :  { %1458 = vst.msk [vmem:[%s2751_s7 + $0x68] sm:$0xff] %vm1444_vm1, %v1241_v17 }
 0x2b9   :  { %v1862_v19 = vpop.f32.mrb[48].mxu0 }
 0x2ba   :  { %v1262_v48 = vadd.f32 %v1862_v19, %v2422_v6  ;;  %v1253_v50 = vpop.f32.mrb[49].mxu0 }
 0x2bb   :  { %v1254_v14 = vadd.f32 %v2422_v6, %v1253_v50  ;;  %v1863_v16 = vpop.f32.mrb[50].mxu0 }
 0x2bc   :  { %1463 = vst.msk [vmem:[%s2751_s7 + $0x90] sm:$0xff] %vm1444_vm1, %v1262_v48  ;;  %v1265_v39 = vadd.f32 %v1863_v16, %v2422_v6  ;;  %v1256_v40 = vpop.f32.mrb[51].mxu0 }
 0x2bd   :  { %1461 = vst.msk [vmem:[%s2751_s7 + $0x80] sm:$0xff] %vm1444_vm1, %v1254_v14  ;;  %v1257_v41 = vadd.f32 %v2422_v6, %v1256_v40 }
 0x2be   :  { %1464 = vst.msk [vmem:[%s2751_s7 + $0x98] sm:$0xff] %vm1444_vm1, %v1265_v39 }
 0x2bf   :  { %1462 = vst.msk [vmem:[%s2751_s7 + $0x88] sm:$0xff] %vm1444_vm1, %v1257_v41 }
 0x2c1   :  { %v1866_v43 = vpop.f32.mrb[52].mxu0 }
 0x2c2   :  { %v1278_v44 = vadd.f32 %v1866_v43, %v2422_v6  ;;  %v1269_v45 = vpop.f32.mrb[53].mxu0 }
 0x2c3   :  { %v1270_v46 = vadd.f32 %v2422_v6, %v1269_v45  ;;  %v1867_v47 = vpop.f32.mrb[54].mxu0 }
 0x2c4   :  { %1467 = vst.msk [vmem:[%s2751_s7 + $0xb0] sm:$0xff] %vm1444_vm1, %v1278_v44  ;;  %v1281_v49 = vadd.f32 %v1867_v47, %v2422_v6  ;;  %v1272_v51 = vpop.f32.mrb[55].mxu0 }
 0x2c5   :  { %1465 = vst.msk [vmem:[%s2751_s7 + $0xa0] sm:$0xff] %vm1444_vm1, %v1270_v46  ;;  %v1273_v53 = vadd.f32 %v2422_v6, %v1272_v51 }
 0x2c6   :  { %1468 = vst.msk [vmem:[%s2751_s7 + $0xb8] sm:$0xff] %vm1444_vm1, %v1281_v49 }
 0x2c7   :  { %1466 = vst.msk [vmem:[%s2751_s7 + $0xa8] sm:$0xff] %vm1444_vm1, %v1273_v53 }
 0x2c9   :  { %v1870_v55 = vpop.f32.mrb[56].mxu0 }
 0x2ca   :  { %v1294_v56 = vadd.f32 %v1870_v55, %v2422_v6  ;;  %v1285_v57 = vpop.f32.mrb[57].mxu0 }
 0x2cb   :  { %v1286_v58 = vadd.f32 %v2422_v6, %v1285_v57  ;;  %v1871_v59 = vpop.f32.mrb[58].mxu0 }
 0x2cc   :  { %1471 = vst.msk [vmem:[%s2751_s7 + $0xd0] sm:$0xff] %vm1444_vm1, %v1294_v56  ;;  %v1297_v60 = vadd.f32 %v1871_v59, %v2422_v6  ;;  %v1288_v61 = vpop.f32.mrb[59].mxu0 }
 0x2cd   :  { %1469 = vst.msk [vmem:[%s2751_s7 + $0xc0] sm:$0xff] %vm1444_vm1, %v1286_v58  ;;  %v1289_v62 = vadd.f32 %v2422_v6, %v1288_v61 }
 0x2ce   :  { %1472 = vst.msk [vmem:[%s2751_s7 + $0xd8] sm:$0xff] %vm1444_vm1, %v1297_v60 }
 0x2cf   :  { %1470 = vst.msk [vmem:[%s2751_s7 + $0xc8] sm:$0xff] %vm1444_vm1, %v1289_v62 }
 0x2d1   :  { %v1874_v63 = vpop.f32.mrb[60].mxu0 }
 0x2d2   :  { %v1310_v0 = vadd.f32 %v1874_v63, %v2422_v6  ;;  %v1301_v1 = vpop.f32.mrb[61].mxu0 }
 0x2d3   :  { %v1302_v2 = vadd.f32 %v2422_v6, %v1301_v1  ;;  %v1875_v3 = vpop.f32.mrb[62].mxu0 }
 0x2d4   :  { %1475 = vst.msk [vmem:[%s2751_s7 + $0xf0] sm:$0xff] %vm1444_vm1, %v1310_v0  ;;  %v1313_v4 = vadd.f32 %v1875_v3, %v2422_v6  ;;  %v1304_v5 = vpop.f32.mrb[63].mxu0 }
 0x2d5   :  { %1473 = vst.msk [vmem:[%s2751_s7 + $0xe0] sm:$0xff] %vm1444_vm1, %v1302_v2  ;;  %v1305_v7 = vadd.f32 %v2422_v6, %v1304_v5 }
 0x2d6   :  { %1476 = vst.msk [vmem:[%s2751_s7 + $0xf8] sm:$0xff] %vm1444_vm1, %v1313_v4 }
 0x2d7   :  { %1474 = vst.msk [vmem:[%s2751_s7 + $0xe8] sm:$0xff] %vm1444_vm1, %v1305_v7 }
 0x2d9   :  { %v1878_v8 = vpop.f32.mrb[64].mxu0 }
 0x2da   :  { %v1326_v9 = vadd.f32 %v1878_v8, %v2422_v6  ;;  %v1317_v21 = vpop.f32.mrb[65].mxu0 }
 0x2db   :  { %v1318_v10 = vadd.f32 %v2422_v6, %v1317_v21  ;;  %v1879_v11 = vpop.f32.mrb[66].mxu0 }
 0x2dc   :  { %1479 = vst.msk [vmem:[%s2751_s7 + $0x110] sm:$0xff] %vm1444_vm1, %v1326_v9  ;;  %v1329_v12 = vadd.f32 %v1879_v11, %v2422_v6  ;;  %v1320_v13 = vpop.f32.mrb[67].mxu0 }
 0x2dd   :  { %1477 = vst.msk [vmem:[%s2751_s7 + $0x100] sm:$0xff] %vm1444_vm1, %v1318_v10  ;;  %v1321_v15 = vadd.f32 %v2422_v6, %v1320_v13 }
 0x2de   :  { %1480 = vst.msk [vmem:[%s2751_s7 + $0x118] sm:$0xff] %vm1444_vm1, %v1329_v12 }
 0x2df   :  { %1478 = vst.msk [vmem:[%s2751_s7 + $0x108] sm:$0xff] %vm1444_vm1, %v1321_v15 }
 0x2e1   :  { %v1882_v18 = vpop.f32.mrb[68].mxu0 }
 0x2e2   :  { %v1342_v20 = vadd.f32 %v1882_v18, %v2422_v6  ;;  %v1333_v22 = vpop.f32.mrb[69].mxu0 }
 0x2e3   :  { %v1334_v24 = vadd.f32 %v2422_v6, %v1333_v22  ;;  %v1883_v25 = vpop.f32.mrb[70].mxu0 }
 0x2e4   :  { %1483 = vst.msk [vmem:[%s2751_s7 + $0x130] sm:$0xff] %vm1444_vm1, %v1342_v20  ;;  %v1345_v26 = vadd.f32 %v1883_v25, %v2422_v6  ;;  %v1336_v27 = vpop.f32.mrb[71].mxu0 }
 0x2e5   :  { %1481 = vst.msk [vmem:[%s2751_s7 + $0x120] sm:$0xff] %vm1444_vm1, %v1334_v24  ;;  %v1337_v28 = vadd.f32 %v2422_v6, %v1336_v27 }
 0x2e6   :  { %1484 = vst.msk [vmem:[%s2751_s7 + $0x138] sm:$0xff] %vm1444_vm1, %v1345_v26 }
 0x2e7   :  { %1482 = vst.msk [vmem:[%s2751_s7 + $0x128] sm:$0xff] %vm1444_vm1, %v1337_v28 }
 0x2e9   :  { %v1886_v29 = vpop.f32.mrb[72].mxu0 }
 0x2ea   :  { %v1358_v30 = vadd.f32 %v1886_v29, %v2422_v6  ;;  %v1349_v31 = vpop.f32.mrb[73].mxu0 }
 0x2eb   :  { %v1350_v32 = vadd.f32 %v2422_v6, %v1349_v31  ;;  %v1887_v33 = vpop.f32.mrb[74].mxu0 }
 0x2ec   :  { %1487 = vst.msk [vmem:[%s2751_s7 + $0x150] sm:$0xff] %vm1444_vm1, %v1358_v30  ;;  %v1361_v34 = vadd.f32 %v1887_v33, %v2422_v6  ;;  %v1352_v35 = vpop.f32.mrb[75].mxu0 }
 0x2ed   :  { %1485 = vst.msk [vmem:[%s2751_s7 + $0x140] sm:$0xff] %vm1444_vm1, %v1350_v32  ;;  %v1353_v36 = vadd.f32 %v2422_v6, %v1352_v35 }
 0x2ee   :  { %1488 = vst.msk [vmem:[%s2751_s7 + $0x158] sm:$0xff] %vm1444_vm1, %v1361_v34 }
 0x2ef   :  { %1486 = vst.msk [vmem:[%s2751_s7 + $0x148] sm:$0xff] %vm1444_vm1, %v1353_v36 }
 0x2f1   :  { %v1890_v37 = vpop.f32.mrb[76].mxu0 }
 0x2f2   :  { %v1374_v38 = vadd.f32 %v1890_v37, %v2422_v6  ;;  %v1365_v42 = vpop.f32.mrb[77].mxu0 }
 0x2f3   :  { %v1366_v23 = vadd.f32 %v2422_v6, %v1365_v42  ;;  %v1891_v52 = vpop.f32.mrb[78].mxu0 }
 0x2f4   :  { %1491 = vst.msk [vmem:[%s2751_s7 + $0x170] sm:$0xff] %vm1444_vm1, %v1374_v38  ;;  %v1377_v54 = vadd.f32 %v1891_v52, %v2422_v6  ;;  %v1368_v17 = vpop.f32.mrb[79].mxu0 }
 0x2f5   :  { %1489 = vst.msk [vmem:[%s2751_s7 + $0x160] sm:$0xff] %vm1444_vm1, %v1366_v23  ;;  %v1369_v19 = vadd.f32 %v2422_v6, %v1368_v17 }
 0x2f6   :  { %1492 = vst.msk [vmem:[%s2751_s7 + $0x178] sm:$0xff] %vm1444_vm1, %v1377_v54 }
 0x2f7   :  { %1490 = vst.msk [vmem:[%s2751_s7 + $0x168] sm:$0xff] %vm1444_vm1, %v1369_v19 }
 0x2f9   :  { %v1894_v48 = vpop.f32.mrb[80].mxu0 }
 0x2fa   :  { %v1390_v50 = vadd.f32 %v1894_v48, %v2422_v6  ;;  %v1381_v14 = vpop.f32.mrb[81].mxu0 }
 0x2fb   :  { %v1382_v16 = vadd.f32 %v2422_v6, %v1381_v14  ;;  %v1895_v39 = vpop.f32.mrb[82].mxu0 }
 0x2fc   :  { %1495 = vst.msk [vmem:[%s2751_s7 + $0x190] sm:$0xff] %vm1444_vm1, %v1390_v50  ;;  %v1393_v40 = vadd.f32 %v1895_v39, %v2422_v6  ;;  %v1384_v41 = vpop.f32.mrb[83].mxu0 }
 0x2fd   :  { %1493 = vst.msk [vmem:[%s2751_s7 + $0x180] sm:$0xff] %vm1444_vm1, %v1382_v16  ;;  %v1385_v43 = vadd.f32 %v2422_v6, %v1384_v41 }
 0x2fe   :  { %1496 = vst.msk [vmem:[%s2751_s7 + $0x198] sm:$0xff] %vm1444_vm1, %v1393_v40 }
 0x2ff   :  { %1494 = vst.msk [vmem:[%s2751_s7 + $0x188] sm:$0xff] %vm1444_vm1, %v1385_v43 }
 0x301   :  { %v1898_v44 = vpop.f32.mrb[84].mxu0 }
 0x302   :  { %v1406_v45 = vadd.f32 %v1898_v44, %v2422_v6  ;;  %v1397_v46 = vpop.f32.mrb[85].mxu0 }
 0x303   :  { %v1398_v47 = vadd.f32 %v2422_v6, %v1397_v46  ;;  %v1899_v49 = vpop.f32.mrb[86].mxu0 }
 0x304   :  { %1499 = vst.msk [vmem:[%s2751_s7 + $0x1b0] sm:$0xff] %vm1444_vm1, %v1406_v45  ;;  %v1409_v51 = vadd.f32 %v1899_v49, %v2422_v6  ;;  %v1400_v53 = vpop.f32.mrb[87].mxu0 }
 0x305   :  { %1497 = vst.msk [vmem:[%s2751_s7 + $0x1a0] sm:$0xff] %vm1444_vm1, %v1398_v47  ;;  %v1401_v55 = vadd.f32 %v2422_v6, %v1400_v53 }
 0x306   :  { %1500 = vst.msk [vmem:[%s2751_s7 + $0x1b8] sm:$0xff] %vm1444_vm1, %v1409_v51 }
 0x307   :  { %1498 = vst.msk [vmem:[%s2751_s7 + $0x1a8] sm:$0xff] %vm1444_vm1, %v1401_v55 }
 0x309   :  { %v1902_v56 = vpop.f32.mrb[88].mxu0 }
 0x30a   :  { %v1422_v57 = vadd.f32 %v1902_v56, %v2422_v6  ;;  %v1413_v58 = vpop.f32.mrb[89].mxu0 }
 0x30b   :  { %v1414_v59 = vadd.f32 %v2422_v6, %v1413_v58  ;;  %v1903_v60 = vpop.f32.mrb[90].mxu0 }
 0x30c   :  { %1503 = vst.msk [vmem:[%s2751_s7 + $0x1d0] sm:$0xff] %vm1444_vm1, %v1422_v57  ;;  %v1425_v61 = vadd.f32 %v1903_v60, %v2422_v6  ;;  %v1416_v62 = vpop.f32.mrb[91].mxu0 }
 0x30d   :  { %1501 = vst.msk [vmem:[%s2751_s7 + $0x1c0] sm:$0xff] %vm1444_vm1, %v1414_v59  ;;  %v1417_v63 = vadd.f32 %v2422_v6, %v1416_v62 }
 0x30e   :  { %1504 = vst.msk [vmem:[%s2751_s7 + $0x1d8] sm:$0xff] %vm1444_vm1, %v1425_v61 }
 0x30f   :  { %1502 = vst.msk [vmem:[%s2751_s7 + $0x1c8] sm:$0xff] %vm1444_vm1, %v1417_v63 }
 0x311   :  { %v1906_v0 = vpop.f32.mrb[92].mxu0 }
 0x312   :  { %v1438_v1 = vadd.f32 %v1906_v0, %v2422_v6  ;;  %v1429_v2 = vpop.f32.mrb[93].mxu0 }
 0x313   :  { %v1430_v3 = vadd.f32 %v2422_v6, %v1429_v2  ;;  %v1907_v4 = vpop.f32.mrb[94].mxu0 }
 0x314   :  { %1507 = vst.msk [vmem:[%s2751_s7 + $0x1f0] sm:$0xff] %vm1444_vm1, %v1438_v1  ;;  %v1441_v5 = vadd.f32 %v1907_v4, %v2422_v6  ;;  %v1432_v7 = vpop.f32.mrb[95].mxu0 }
 0x315   :  { %1505 = vst.msk [vmem:[%s2751_s7 + $0x1e0] sm:$0xff] %vm1444_vm1, %v1430_v3  ;;  %v1433_v8 = vadd.f32 %v2422_v6, %v1432_v7 }
 0x316   :  { %1508 = vst.msk [vmem:[%s2751_s7 + $0x1f8] sm:$0xff] %vm1444_vm1, %v1441_v5 }
 0x317   :  { %1506 = vst.msk [vmem:[%s2751_s7 + $0x1e8] sm:$0xff] %vm1444_vm1, %v1433_v8 }

</bundles_post_ra>
